<compile_context>
chip_gen: v7x
topology: tpu7x:2x2x1
jax: 0.10.0
libtpu: 0.0.40
codegen_flags: <defaults>
</compile_context>

<pallas_src>
import jax
import jax.numpy as jnp
from jax import lax
from jax.experimental import pallas as pl
from jax.experimental.pallas import tpu as pltpu


EPS = 1e-5


def bn_relu_kernel(x_ref, gamma_ref, beta_ref, o_ref):
    # x_ref: (C, M) with M = N*H*W. gamma_ref/beta_ref: (C, 1).
    x = x_ref[...].astype(jnp.float32)                       # (C, M)
    m = x.shape[1]
    inv_m = 1.0 / m

    # One-pass per-channel statistics (sum and sum of squares, lane reduction).
    # Note: E[x^2] - mean^2 is fine here (post-conv-style activations, f32);
    # switch to the two-pass form only if inputs could have |mean| >> std.
    s = jnp.sum(x, axis=1, keepdims=True)                    # (C, 1)
    ss = jnp.sum(x * x, axis=1, keepdims=True)               # (C, 1)
    mean = s * inv_m                                         # (C, 1)
    var = ss * inv_m - mean * mean                           # biased variance
    inv_std = lax.rsqrt(var + EPS)                           # (C, 1)

    # Fold affine into per-channel scale/shift (all (C, 1) work, no big-tensor ops).
    scale = gamma_ref[...].astype(jnp.float32) * inv_std     # (C, 1)
    shift = beta_ref[...].astype(jnp.float32) - mean * scale  # (C, 1)

    # Single fused big-tensor op: y = max(x * scale + shift, 0)
    o_ref[...] = jnp.maximum(x * scale + shift, 0.0).astype(o_ref.dtype)


def batchnorm_relu(x_nchw, gamma, beta):
    """x_nchw: (N, C, H, W) float32. gamma, beta: (C,) float32."""
    N, C, H, W = x_nchw.shape
    M = N * H * W

    if N == 1:
        # Free view: NCHW with N=1 is already channel-major.
        x2d = x_nchw.reshape(C, M)
    else:
        # General-batch fallback (incurs a transpose; not hit by this module).
        x2d = jnp.transpose(x_nchw, (1, 0, 2, 3)).reshape(C, M)

    gamma2d = gamma.reshape(C, 1)
    beta2d = beta.reshape(C, 1)

    out2d = pl.pallas_call(
        bn_relu_kernel,
        out_shape=jax.ShapeDtypeStruct((C, M), x_nchw.dtype),
        grid=(1,),
        in_specs=[
            pl.BlockSpec((C, M), lambda i: (0, 0)),
            pl.BlockSpec((C, 1), lambda i: (0, 0)),
            pl.BlockSpec((C, 1), lambda i: (0, 0)),
        ],
        out_specs=pl.BlockSpec((C, M), lambda i: (0, 0)),
        compiler_params=pltpu.CompilerParams(
            dimension_semantics=("arbitrary",)
        ),
    )(x2d, gamma2d, beta2d)

    if N == 1:
        return out2d.reshape(1, C, H, W)       # free view back to NCHW
    return jnp.transpose(out2d.reshape(C, N, H, W), (1, 0, 2, 3))


def reference(x_nchw, gamma, beta):
    mean = jnp.mean(x_nchw, axis=(0, 2, 3), keepdims=True)
    var = jnp.mean((x_nchw - mean) ** 2, axis=(0, 2, 3), keepdims=True)
    y = (x_nchw - mean) / jnp.sqrt(var + EPS)
    y = y * gamma.reshape(1, -1, 1, 1) + beta.reshape(1, -1, 1, 1)
    return jnp.maximum(y, 0.0)


if __name__ == "__main__":
    key = jax.random.PRNGKey(0)
    kx, kg, kb = jax.random.split(key, 3)

    N, C, H, W = 1, 512, 7, 7  # matches BatchNorm2d(512) and the module's input
    x = jax.random.normal(kx, (N, C, H, W), dtype=jnp.float32)
    # Deterministic non-trivial affine params (PyTorch default is gamma=1, beta=0)
    gamma = 1.0 + 0.1 * jax.random.normal(kg, (C,), dtype=jnp.float32)
    beta = 0.1 * jax.random.normal(kb, (C,), dtype=jnp.float32)

    out = batchnorm_relu(x, gamma, beta)
    out = jax.block_until_ready(out)

    ref = reference(x, gamma, beta)
    assert out.shape == (N, C, H, W)
    assert jnp.allclose(out, ref, atol=1e-4, rtol=1e-4), (
        f"max abs diff {jnp.max(jnp.abs(out - ref))}"
    )
    print("KERNEL_OK")
</pallas_src>

<mosaic_0001>
module attributes {stable_mosaic.version = 11 : i64} {
  func.func @bn_relu_kernel(%arg0: i32, %arg1: memref<512x49xf32, #tpu.memory_space<vmem>>, %arg2: memref<512x1xf32, #tpu.memory_space<vmem>>, %arg3: memref<512x1xf32, #tpu.memory_space<vmem>>, %arg4: memref<512x49xf32, #tpu.memory_space<vmem>>) attributes {dimension_semantics = [#tpu.dimension_semantics<arbitrary>], iteration_bounds = array<i64: 1>, scalar_prefetch = 0 : i64, scratch_operands = 0 : i64, tpu.core_type = #tpu.core_type<tc>, window_params = [{pipeline_mode = #tpu.pipeline_mode<synchronous>, transform_indices = @transform_0, window_bounds = array<i64: 512, 49>}, {pipeline_mode = #tpu.pipeline_mode<synchronous>, transform_indices = @transform_1, window_bounds = array<i64: 512, 1>}, {pipeline_mode = #tpu.pipeline_mode<synchronous>, transform_indices = @transform_2, window_bounds = array<i64: 512, 1>}, {pipeline_mode = #tpu.pipeline_mode<synchronous>, transform_indices = @transform_3, window_bounds = array<i64: 512, 49>}]} {
    %c0 = arith.constant 0 : index
    %c0_0 = arith.constant 0 : index
    %0 = vector.load %arg1[%c0, %c0_0] : memref<512x49xf32, #tpu.memory_space<vmem>>, vector<512x49xf32>
    %cst = arith.constant dense<0.000000e+00> : vector<512xf32>
    %1 = vector.multi_reduction <add>, %0, %cst [1] : vector<512x49xf32> to vector<512xf32>
    %2 = vector.shape_cast %1 : vector<512xf32> to vector<512x1xf32>
    %3 = arith.mulf %0, %0 : vector<512x49xf32>
    %cst_1 = arith.constant dense<0.000000e+00> : vector<512xf32>
    %4 = vector.multi_reduction <add>, %3, %cst_1 [1] : vector<512x49xf32> to vector<512xf32>
    %5 = vector.shape_cast %4 : vector<512xf32> to vector<512x1xf32>
    %cst_2 = arith.constant 0.0204081628 : f32
    %6 = vector.broadcast %cst_2 : f32 to vector<512x1xf32>
    %7 = arith.mulf %2, %6 : vector<512x1xf32>
    %cst_3 = arith.constant 0.0204081628 : f32
    %8 = vector.broadcast %cst_3 : f32 to vector<512x1xf32>
    %9 = arith.mulf %5, %8 : vector<512x1xf32>
    %10 = arith.mulf %7, %7 : vector<512x1xf32>
    %11 = arith.subf %9, %10 : vector<512x1xf32>
    %cst_4 = arith.constant 9.99999974E-6 : f32
    %12 = vector.broadcast %cst_4 : f32 to vector<512x1xf32>
    %13 = arith.addf %11, %12 : vector<512x1xf32>
    %14 = math.rsqrt %13 : vector<512x1xf32>
    %c0_5 = arith.constant 0 : index
    %c0_6 = arith.constant 0 : index
    %15 = vector.load %arg2[%c0_5, %c0_6] : memref<512x1xf32, #tpu.memory_space<vmem>>, vector<512x1xf32>
    %16 = arith.mulf %15, %14 : vector<512x1xf32>
    %c0_7 = arith.constant 0 : index
    %c0_8 = arith.constant 0 : index
    %17 = vector.load %arg3[%c0_7, %c0_8] : memref<512x1xf32, #tpu.memory_space<vmem>>, vector<512x1xf32>
    %18 = arith.mulf %7, %16 : vector<512x1xf32>
    %19 = arith.subf %17, %18 : vector<512x1xf32>
    %20 = vector.broadcast %16 : vector<512x1xf32> to vector<512x49xf32>
    %21 = arith.mulf %0, %20 : vector<512x49xf32>
    %22 = vector.broadcast %19 : vector<512x1xf32> to vector<512x49xf32>
    %23 = arith.addf %21, %22 : vector<512x49xf32>
    %cst_9 = arith.constant 0.000000e+00 : f32
    %24 = vector.broadcast %cst_9 : f32 to vector<512x49xf32>
    %25 = arith.maximumf %23, %24 : vector<512x49xf32>
    %c0_10 = arith.constant 0 : index
    %c0_11 = arith.constant 0 : index
    %26 = vector.load %arg4[%c0_10, %c0_11] : memref<512x49xf32, #tpu.memory_space<vmem>>, vector<512x49xf32>
    tpu.vector_store %arg4[%c0_10, %c0_11], %25 {strides = array<i32>} : memref<512x49xf32, #tpu.memory_space<vmem>>, vector<512x49xf32>,
    return
  }
  func.func @transform_0(%arg0: i32) -> (i32, i32) {
    %c0_i32 = arith.constant 0 : i32
    %c0_i32_0 = arith.constant 0 : i32
    %c0_i32_1 = arith.constant 0 : i32
    return %c0_i32, %c0_i32_0 : i32, i32
  }
  func.func @transform_1(%arg0: i32) -> (i32, i32) {
    %c0_i32 = arith.constant 0 : i32
    %c0_i32_0 = arith.constant 0 : i32
    %c0_i32_1 = arith.constant 0 : i32
    return %c0_i32, %c0_i32_0 : i32, i32
  }
  func.func @transform_2(%arg0: i32) -> (i32, i32) {
    %c0_i32 = arith.constant 0 : i32
    %c0_i32_0 = arith.constant 0 : i32
    %c0_i32_1 = arith.constant 0 : i32
    return %c0_i32, %c0_i32_0 : i32, i32
  }
  func.func @transform_3(%arg0: i32) -> (i32, i32) {
    %c0_i32 = arith.constant 0 : i32
    %c0_i32_0 = arith.constant 0 : i32
    %c0_i32_1 = arith.constant 0 : i32
    return %c0_i32, %c0_i32_0 : i32, i32
  }
}

</mosaic_0001>

<bundles_post_ra>
// kernel: tpu_custom_call.1
= control target key start
LH: loop header
LB: loop body
LE: loop exit
PB: predicated region body
PF: predicated region fallthrough
CT: control target
= control target key end

     0   :  { %vm78_vm0 = vcmask 400384   ;;  %s4779_s0 = inlined_call_operand.vmem [shape: f32[512,49], index: 0, kind: input, shape index: {}]   ;;  %s4780_s1 = inlined_call_operand.vmem [shape: f32[512,1], index: 1, kind: input, shape index: {}]   ;;  %s4781_s2 = inlined_call_operand.vmem [shape: f32[512,1], index: 2, kind: input, shape index: {}]   ;;  %s4782_s3 = inlined_call_operand.vmem [shape: f32[512,49], index: 3, kind: output, shape index: {}]  }
   0x1   :  { %v2350_v0 = vld [vmem:[%s4779_s0 + $0x10] sm:$0xff]  ;;  %v2355_v1 = vld [vmem:[%s4779_s0] sm:$0xff]  ;;  %v2360_v2 = vld [vmem:[%s4779_s0 + $0x18] sm:$0xff] }
   0x2   :  { %v85_v3 = vsel %vm78_vm0, %v2350_v0, 0.0  ;;  %v79_v4 = vsel %vm78_vm0, %v2355_v1, 0.0  ;;  %v2369_v5 = vld [vmem:[%s4779_s0 + $0x8] sm:$0xff]  ;;  %v88_v6 = vsel %vm78_vm0, %v2360_v2, 0.0  ;;  %v2383_v9 = vld [vmem:[%s4779_s0 + $0x20] sm:$0xff]  ;;  %v2392_v12 = vld [vmem:[%s4779_s0 + $0x38] sm:$0xff] }
   0x3   :  { %86 = vadd.xlane.f32.xlu1 %v85_v3  ;;  %80 = vadd.xlane.f32.xlu0 %v79_v4  ;;  %v82_v7 = vsel %vm78_vm0, %v2369_v5, 0.0  ;;  %v2378_v8 = vld [vmem:[%s4779_s0 + $0x28] sm:$0xff]  ;;  %v91_v11 = vsel %vm78_vm0, %v2383_v9, 0.0  ;;  %v2397_v13 = vld [vmem:[%s4779_s0 + $0x30] sm:$0xff]  ;;  %v100_v14 = vsel %vm78_vm0, %v2392_v12, 0.0  ;;  %v2411_v17 = vld [vmem:[%s4779_s0 + $0x40] sm:$0xff] }
   0x4   :  { %v94_v10 = vsel %vm78_vm0, %v2378_v8, 0.0  ;;  %v97_v15 = vsel %vm78_vm0, %v2397_v13, 0.0  ;;  %v2406_v16 = vld [vmem:[%s4779_s0 + $0x48] sm:$0xff]  ;;  %v103_v19 = vsel %vm78_vm0, %v2411_v17, 0.0  ;;  %v2420_v20 = vld [vmem:[%s4779_s0 + $0x58] sm:$0xff]  ;;  %v2425_v21 = vld [vmem:[%s4779_s0 + $0x50] sm:$0xff] }
   0x5   :  { %v106_v18 = vsel %vm78_vm0, %v2406_v16, 0.0  ;;  %v112_v22 = vsel %vm78_vm0, %v2420_v20, 0.0  ;;  %v109_v23 = vsel %vm78_vm0, %v2425_v21, 0.0  ;;  %v2434_v24 = vld [vmem:[%s4779_s0 + $0x68] sm:$0xff]  ;;  %v2439_v25 = vld [vmem:[%s4779_s0 + $0x60] sm:$0xff]  ;;  %v2448_v28 = vld [vmem:[%s4779_s0 + $0x78] sm:$0xff] }
   0x6   :  { %v118_v26 = vsel %vm78_vm0, %v2434_v24, 0.0  ;;  %v115_v27 = vsel %vm78_vm0, %v2439_v25, 0.0  ;;  %v2453_v29 = vld [vmem:[%s4779_s0 + $0x70] sm:$0xff]  ;;  %v124_v30 = vsel %vm78_vm0, %v2448_v28, 0.0  ;;  %v2462_v32 = vld [vmem:[%s4779_s0 + $0x88] sm:$0xff]  ;;  %v2467_v33 = vld [vmem:[%s4779_s0 + $0x80] sm:$0xff] }
   0x7   :  { %89 = vadd.xlane.f32.xlu1 %v88_v6  ;;  %83 = vadd.xlane.f32.xlu0 %v82_v7  ;;  %v121_v31 = vsel %vm78_vm0, %v2453_v29, 0.0  ;;  %v130_v34 = vsel %vm78_vm0, %v2462_v32, 0.0  ;;  %v127_v35 = vsel %vm78_vm0, %v2467_v33, 0.0  ;;  %v2476_v36 = vld [vmem:[%s4779_s0 + $0x98] sm:$0xff]  ;;  %v2481_v37 = vld [vmem:[%s4779_s0 + $0x90] sm:$0xff]  ;;  %v2490_v40 = vld [vmem:[%s4779_s0 + $0xa8] sm:$0xff] }
   0x8   :  { %v136_v38 = vsel %vm78_vm0, %v2476_v36, 0.0  ;;  %v133_v39 = vsel %vm78_vm0, %v2481_v37, 0.0  ;;  %v2495_v41 = vld [vmem:[%s4779_s0 + $0xa0] sm:$0xff]  ;;  %v142_v42 = vsel %vm78_vm0, %v2490_v40, 0.0  ;;  %v2504_v44 = vld [vmem:[%s4779_s0 + $0xb8] sm:$0xff]  ;;  %v2509_v45 = vld [vmem:[%s4779_s0 + $0xb0] sm:$0xff] }
   0x9   :  { %v139_v43 = vsel %vm78_vm0, %v2495_v41, 0.0  ;;  %v148_v46 = vsel %vm78_vm0, %v2504_v44, 0.0  ;;  %v145_v47 = vsel %vm78_vm0, %v2509_v45, 0.0  ;;  %v2518_v48 = vld [vmem:[%s4779_s0 + $0xc8] sm:$0xff]  ;;  %v2523_v49 = vld [vmem:[%s4779_s0 + $0xc0] sm:$0xff]  ;;  %v2532_v52 = vld [vmem:[%s4779_s0 + $0xd8] sm:$0xff] }
   0xa   :  { %v154_v50 = vsel %vm78_vm0, %v2518_v48, 0.0  ;;  %v151_v51 = vsel %vm78_vm0, %v2523_v49, 0.0  ;;  %v2537_v53 = vld [vmem:[%s4779_s0 + $0xd0] sm:$0xff]  ;;  %v160_v54 = vsel %vm78_vm0, %v2532_v52, 0.0  ;;  %v2546_v56 = vld [vmem:[%s4779_s0 + $0xe8] sm:$0xff]  ;;  %v2551_v57 = vld [vmem:[%s4779_s0 + $0xe0] sm:$0xff] }
   0xb   :  { %95 = vadd.xlane.f32.xlu1 %v94_v10  ;;  %92 = vadd.xlane.f32.xlu0 %v91_v11  ;;  %v157_v55 = vsel %vm78_vm0, %v2537_v53, 0.0  ;;  %v166_v58 = vsel %vm78_vm0, %v2546_v56, 0.0  ;;  %v163_v59 = vsel %vm78_vm0, %v2551_v57, 0.0  ;;  %v2560_v60 = vld [vmem:[%s4779_s0 + $0xf8] sm:$0xff]  ;;  %v2565_v61 = vld [vmem:[%s4779_s0 + $0xf0] sm:$0xff]  ;;  %v2574_v3 = vld [vmem:[%s4779_s0 + $0x108] sm:$0xff] }
   0xc   :  { %v172_v62 = vsel %vm78_vm0, %v2560_v60, 0.0  ;;  %v169_v63 = vsel %vm78_vm0, %v2565_v61, 0.0  ;;  %v2579_v4 = vld [vmem:[%s4779_s0 + $0x100] sm:$0xff]  ;;  %v178_v6 = vsel %vm78_vm0, %v2574_v3, 0.0  ;;  %v2588_v10 = vld [vmem:[%s4779_s0 + $0x118] sm:$0xff]  ;;  %v2593_v11 = vld [vmem:[%s4779_s0 + $0x110] sm:$0xff] }
   0xd   :  { %v175_v7 = vsel %vm78_vm0, %v2579_v4, 0.0 }
   0xf   :  { %101 = vadd.xlane.f32.xlu1 %v100_v14  ;;  %98 = vadd.xlane.f32.xlu0 %v97_v15  ;;  %v184_v14 = vsel %vm78_vm0, %v2588_v10, 0.0  ;;  %v181_v15 = vsel %vm78_vm0, %v2593_v11, 0.0 }
  0x13   :  { %107 = vadd.xlane.f32.xlu1 %v106_v18  ;;  %104 = vadd.xlane.f32.xlu0 %v103_v19  ;;  %v2602_v18 = vld [vmem:[%s4779_s0 + $0x128] sm:$0xff]  ;;  %v2607_v19 = vld [vmem:[%s4779_s0 + $0x120] sm:$0xff] }
  0x17   :  { %113 = vadd.xlane.f32.xlu1 %v112_v22  ;;  %110 = vadd.xlane.f32.xlu0 %v109_v23  ;;  %v190_v22 = vsel %vm78_vm0, %v2602_v18, 0.0  ;;  %v187_v23 = vsel %vm78_vm0, %v2607_v19, 0.0 }
  0x1b   :  { %119 = vadd.xlane.f32.xlu1 %v118_v26  ;;  %116 = vadd.xlane.f32.xlu0 %v115_v27  ;;  %v2616_v26 = vld [vmem:[%s4779_s0 + $0x138] sm:$0xff]  ;;  %v2621_v27 = vld [vmem:[%s4779_s0 + $0x130] sm:$0xff] }
  0x1f   :  { %125 = vadd.xlane.f32.xlu1 %v124_v30  ;;  %122 = vadd.xlane.f32.xlu0 %v121_v31  ;;  %v196_v30 = vsel %vm78_vm0, %v2616_v26, 0.0  ;;  %v193_v31 = vsel %vm78_vm0, %v2621_v27, 0.0 }
  0x23   :  { %131 = vadd.xlane.f32.xlu1 %v130_v34  ;;  %128 = vadd.xlane.f32.xlu0 %v127_v35  ;;  %v2630_v34 = vld [vmem:[%s4779_s0 + $0x148] sm:$0xff]  ;;  %v2635_v35 = vld [vmem:[%s4779_s0 + $0x140] sm:$0xff] }
  0x27   :  { %137 = vadd.xlane.f32.xlu1 %v136_v38  ;;  %134 = vadd.xlane.f32.xlu0 %v133_v39  ;;  %v202_v38 = vsel %vm78_vm0, %v2630_v34, 0.0  ;;  %v199_v39 = vsel %vm78_vm0, %v2635_v35, 0.0 }
  0x2b   :  { %143 = vadd.xlane.f32.xlu1 %v142_v42  ;;  %140 = vadd.xlane.f32.xlu0 %v139_v43  ;;  %v2644_v42 = vld [vmem:[%s4779_s0 + $0x158] sm:$0xff]  ;;  %v2649_v43 = vld [vmem:[%s4779_s0 + $0x150] sm:$0xff] }
  0x2f   :  { %149 = vadd.xlane.f32.xlu1 %v148_v46  ;;  %146 = vadd.xlane.f32.xlu0 %v145_v47  ;;  %v208_v46 = vsel %vm78_vm0, %v2644_v42, 0.0  ;;  %v205_v47 = vsel %vm78_vm0, %v2649_v43, 0.0 }
  0x33   :  { %155 = vadd.xlane.f32.xlu1 %v154_v50  ;;  %152 = vadd.xlane.f32.xlu0 %v151_v51  ;;  %v2658_v50 = vld [vmem:[%s4779_s0 + $0x168] sm:$0xff]  ;;  %v2663_v51 = vld [vmem:[%s4779_s0 + $0x160] sm:$0xff] }
  0x37   :  { %161 = vadd.xlane.f32.xlu1 %v160_v54  ;;  %158 = vadd.xlane.f32.xlu0 %v157_v55  ;;  %v214_v54 = vsel %vm78_vm0, %v2658_v50, 0.0  ;;  %v211_v55 = vsel %vm78_vm0, %v2663_v51, 0.0 }
  0x3b   :  { %167 = vadd.xlane.f32.xlu1 %v166_v58  ;;  %164 = vadd.xlane.f32.xlu0 %v163_v59  ;;  %v2672_v58 = vld [vmem:[%s4779_s0 + $0x178] sm:$0xff]  ;;  %v2677_v59 = vld [vmem:[%s4779_s0 + $0x170] sm:$0xff] }
  0x3f   :  { %173 = vadd.xlane.f32.xlu1 %v172_v62  ;;  %170 = vadd.xlane.f32.xlu0 %v169_v63  ;;  %v220_v62 = vsel %vm78_vm0, %v2672_v58, 0.0  ;;  %v217_v63 = vsel %vm78_vm0, %v2677_v59, 0.0 }
  0x43   :  { %179 = vadd.xlane.f32.xlu1 %v178_v6  ;;  %176 = vadd.xlane.f32.xlu0 %v175_v7  ;;  %v2686_v6 = vld [vmem:[%s4779_s0 + $0x188] sm:$0xff]  ;;  %v2691_v7 = vld [vmem:[%s4779_s0 + $0x180] sm:$0xff] }
  0x47   :  { %185 = vadd.xlane.f32.xlu1 %v184_v14  ;;  %182 = vadd.xlane.f32.xlu0 %v181_v15  ;;  %v226_v14 = vsel %vm78_vm0, %v2686_v6, 0.0  ;;  %v223_v15 = vsel %vm78_vm0, %v2691_v7, 0.0 }
  0x4b   :  { %191 = vadd.xlane.f32.xlu1 %v190_v22  ;;  %188 = vadd.xlane.f32.xlu0 %v187_v23  ;;  %v2700_v22 = vld [vmem:[%s4779_s0 + $0x198] sm:$0xff]  ;;  %v2705_v23 = vld [vmem:[%s4779_s0 + $0x190] sm:$0xff] }
  0x4f   :  { %197 = vadd.xlane.f32.xlu1 %v196_v30  ;;  %194 = vadd.xlane.f32.xlu0 %v193_v31  ;;  %v232_v30 = vsel %vm78_vm0, %v2700_v22, 0.0  ;;  %v229_v31 = vsel %vm78_vm0, %v2705_v23, 0.0 }
  0x53   :  { %203 = vadd.xlane.f32.xlu1 %v202_v38  ;;  %200 = vadd.xlane.f32.xlu0 %v199_v39  ;;  %v2714_v38 = vld [vmem:[%s4779_s0 + $0x1a8] sm:$0xff]  ;;  %v2719_v39 = vld [vmem:[%s4779_s0 + $0x1a0] sm:$0xff] }
  0x57   :  { %209 = vadd.xlane.f32.xlu1 %v208_v46  ;;  %206 = vadd.xlane.f32.xlu0 %v205_v47  ;;  %v238_v46 = vsel %vm78_vm0, %v2714_v38, 0.0  ;;  %v235_v47 = vsel %vm78_vm0, %v2719_v39, 0.0 }
  0x5b   :  { %215 = vadd.xlane.f32.xlu1 %v214_v54  ;;  %212 = vadd.xlane.f32.xlu0 %v211_v55  ;;  %v2728_v54 = vld [vmem:[%s4779_s0 + $0x1b8] sm:$0xff]  ;;  %v2733_v55 = vld [vmem:[%s4779_s0 + $0x1b0] sm:$0xff] }
  0x5c   :  { %4865 = vst [vmem:[#allocation2_spill] sm:$0xff] %v2728_v54  ;;  %4866 = vst [vmem:[#allocation3_spill] sm:$0xff] %v2733_v55 }
  0x5f   :  { %221 = vadd.xlane.f32.xlu1 %v220_v62  ;;  %218 = vadd.xlane.f32.xlu0 %v217_v63  ;;  %v244_v62 = vsel %vm78_vm0, %v2728_v54, 0.0  ;;  %v241_v63 = vsel %vm78_vm0, %v2733_v55, 0.0 }
  0x63   :  { %227 = vadd.xlane.f32.xlu1 %v226_v14  ;;  %224 = vadd.xlane.f32.xlu0 %v223_v15  ;;  %v2742_v14 = vld [vmem:[%s4779_s0 + $0x1c8] sm:$0xff]  ;;  %v2747_v15 = vld [vmem:[%s4779_s0 + $0x1c0] sm:$0xff] }
  0x64   :  { %4867 = vst [vmem:[#allocation4_spill] sm:$0xff] %v2742_v14  ;;  %4868 = vst [vmem:[#allocation5_spill] sm:$0xff] %v2747_v15 }
  0x67   :  { %233 = vadd.xlane.f32.xlu1 %v232_v30  ;;  %230 = vadd.xlane.f32.xlu0 %v229_v31  ;;  %v250_v30 = vsel %vm78_vm0, %v2742_v14, 0.0  ;;  %v247_v31 = vsel %vm78_vm0, %v2747_v15, 0.0  ;;  %v2770_v15 = vld [vmem:[%s4779_s0 + $0x1e8] sm:$0xff]  ;;  %v2775_v14 = vld [vmem:[%s4779_s0 + $0x1e0] sm:$0xff] }
  0x68   :  { %4871 = vst [vmem:[#allocation8_spill] sm:$0xff] %v2770_v15  ;;  %4872 = vst [vmem:[#allocation9_spill] sm:$0xff] %v2775_v14 }
  0x6b   :  { %239 = vadd.xlane.f32.xlu1 %v238_v46  ;;  %236 = vadd.xlane.f32.xlu0 %v235_v47  ;;  %v2756_v46 = vld [vmem:[%s4779_s0 + $0x1d8] sm:$0xff]  ;;  %v2761_v47 = vld [vmem:[%s4779_s0 + $0x1d0] sm:$0xff] }
  0x6c   :  { %4869 = vst [vmem:[#allocation6_spill] sm:$0xff] %v2756_v46  ;;  %4870 = vst [vmem:[#allocation7_spill] sm:$0xff] %v2761_v47 }
  0x6f   :  { %245 = vadd.xlane.f32.xlu1 %v244_v62  ;;  %242 = vadd.xlane.f32.xlu0 %v241_v63  ;;  %v256_v62 = vsel %vm78_vm0, %v2756_v46, 0.0  ;;  %v253_v63 = vsel %vm78_vm0, %v2761_v47, 0.0  ;;  %v2784_v47 = vld [vmem:[%s4779_s0 + $0x1f8] sm:$0xff]  ;;  %v2789_v46 = vld [vmem:[%s4779_s0 + $0x1f0] sm:$0xff] }
  0x70   :  { %4873 = vst [vmem:[#allocation10_spill] sm:$0xff] %v2789_v46 }
  0x73   :  { %251 = vadd.xlane.f32.xlu1 %v250_v30  ;;  %248 = vadd.xlane.f32.xlu0 %v247_v31  ;;  %v262_v30 = vsel %vm78_vm0, %v2770_v15, 0.0  ;;  %v259_v31 = vsel %vm78_vm0, %v2775_v14, 0.0  ;;  %v272_v14 = vmul.f32 %v2369_v5, %v2369_v5  ;;  %v271_v15 = vmul.f32 %v2355_v1, %v2355_v1 }
  0x74   :  { %v276_v1 = vmul.f32 %v2378_v8, %v2378_v8 }
  0x75   :  { %v338_v55 = vsel %vm78_vm0, %v272_v14, 0.0  ;;  %v335_v54 = vsel %vm78_vm0, %v271_v15, 0.0  ;;  %v275_v14 = vmul.f32 %v2383_v9, %v2383_v9  ;;  %v280_v9 = vmul.f32 %v2406_v16, %v2406_v16 }
  0x76   :  { %v350_v15 = vsel %vm78_vm0, %v276_v1, 0.0 }
  0x77   :  { %257 = vadd.xlane.f32.xlu1 %v256_v62  ;;  %254 = vadd.xlane.f32.xlu0 %v253_v63  ;;  %v268_v62 = vsel %vm78_vm0, %v2784_v47, 0.0  ;;  %v265_v63 = vsel %vm78_vm0, %v2789_v46, 0.0 }
  0x7b   :  { %263 = vadd.xlane.f32.xlu1 %v262_v30  ;;  %260 = vadd.xlane.f32.xlu0 %v259_v31  ;;  %v274_v30 = vmul.f32 %v2360_v2, %v2360_v2  ;;  %v273_v31 = vmul.f32 %v2350_v0, %v2350_v0  ;;  %v347_v2 = vsel %vm78_vm0, %v275_v14, 0.0  ;;  %v278_v0 = vmul.f32 %v2392_v12, %v2392_v12 }
  0x7c   :  { %v284_v14 = vmul.f32 %v2434_v24, %v2434_v24 }
  0x7d   :  { %v344_v46 = vsel %vm78_vm0, %v274_v30, 0.0  ;;  %v341_v5 = vsel %vm78_vm0, %v273_v31, 0.0  ;;  %v282_v30 = vmul.f32 %v2420_v20, %v2420_v20  ;;  %v281_v31 = vmul.f32 %v2425_v21, %v2425_v21 }
  0x7f   :  { %269 = vadd.xlane.f32.xlu1 %v268_v62  ;;  %266 = vadd.xlane.f32.xlu0 %v265_v63  ;;  %v365_v1 = vsel %vm78_vm0, %v281_v31, 0.0  ;;  %v290_v31 = vmul.f32 %v2476_v36, %v2476_v36  ;;  %v2326_v36 = vmov 0  }
  0x80   :  { %2133 = vset.pattern.permute.xlu1 %v2326_v36  ;;  %2132 = vset.pattern.permute.xlu0 %v2326_v36  ;;  %v300_v36 = vmul.f32 %v2546_v56, %v2546_v56 }
  0x83   :  { %339 = vadd.xlane.f32.xlu1 %v338_v55  ;;  %336 = vadd.xlane.f32.xlu0 %v335_v54  ;;  %v277_v54 = vmul.f32 %v2397_v13, %v2397_v13  ;;  %v356_v55 = vsel %vm78_vm0, %v278_v0, 0.0  ;;  %v362_v13 = vsel %vm78_vm0, %v280_v9, 0.0 }
  0x85   :  { %v353_v8 = vsel %vm78_vm0, %v277_v54, 0.0  ;;  %v286_v54 = vmul.f32 %v2448_v28, %v2448_v28 }
  0x87   :  { %345 = vadd.xlane.f32.xlu1 %v344_v46  ;;  %342 = vadd.xlane.f32.xlu0 %v341_v5  ;;  %v279_v46 = vmul.f32 %v2411_v17, %v2411_v17  ;;  %v368_v5 = vsel %vm78_vm0, %v282_v30, 0.0 }
  0x89   :  { %v359_v63 = vsel %vm78_vm0, %v279_v46, 0.0  ;;  %v288_v46 = vmul.f32 %v2462_v32, %v2462_v32 }
  0x8b   :  { %351 = vadd.xlane.f32.xlu1 %v350_v15  ;;  %348 = vadd.xlane.f32.xlu0 %v347_v2  ;;  %v283_v15 = vmul.f32 %v2439_v25, %v2439_v25  ;;  %v374_v2 = vsel %vm78_vm0, %v284_v14, 0.0 }
  0x8d   :  { %v371_v0 = vsel %vm78_vm0, %v283_v15, 0.0  ;;  %v292_v15 = vmul.f32 %v2490_v40, %v2490_v40  ;;  %v293_v40 = vmul.f32 %v2509_v45, %v2509_v45 }
  0x8f   :  { %357 = vadd.xlane.f32.xlu1 %v356_v55  ;;  %354 = vadd.xlane.f32.xlu0 %v353_v8  ;;  %v285_v55 = vmul.f32 %v2453_v29, %v2453_v29  ;;  %v380_v8 = vsel %vm78_vm0, %v286_v54, 0.0  ;;  %v398_v54 = vsel %vm78_vm0, %v292_v15, 0.0 }
  0x90   :  { %v2823_v62 = vpop.xlane.xlu1 %86  ;;  %v2825_v12 = vpop.xlane.xlu0 %80 }
  0x91   :  { %v377_v9 = vsel %vm78_vm0, %v285_v55, 0.0 }
  0x93   :  { %363 = vadd.xlane.f32.xlu1 %v362_v13  ;;  %360 = vadd.xlane.f32.xlu0 %v359_v63  ;;  %v287_v13 = vmul.f32 %v2467_v33, %v2467_v33  ;;  %v386_v63 = vsel %vm78_vm0, %v288_v46, 0.0 }
  0x94   :  { %v2833_v16 = vpop.xlane.xlu1 %89  ;;  %v2835_v17 = vpop.xlane.xlu0 %83 }
  0x95   :  { %v383_v30 = vsel %vm78_vm0, %v287_v13, 0.0  ;;  %v401_v13 = vsel %vm78_vm0, %v293_v40, 0.0  ;;  %v302_v40 = vmul.f32 %v2560_v60, %v2560_v60 }
  0x97   :  { %369 = vadd.xlane.f32.xlu1 %v368_v5  ;;  %366 = vadd.xlane.f32.xlu0 %v365_v1  ;;  %v289_v5 = vmul.f32 %v2481_v37, %v2481_v37  ;;  %v392_v1 = vsel %vm78_vm0, %v290_v31, 0.0 }
  0x98   :  { %v2843_v20 = vpop.xlane.xlu1 %95  ;;  %v2845_v21 = vpop.xlane.xlu0 %92 }
  0x99   :  { %v389_v14 = vsel %vm78_vm0, %v289_v5, 0.0 }
  0x9b   :  { %375 = vadd.xlane.f32.xlu1 %v374_v2  ;;  %372 = vadd.xlane.f32.xlu0 %v371_v0  ;;  %v291_v2 = vmul.f32 %v2495_v41, %v2495_v41 }
  0x9c   :  { %v2853_v24 = vpop.xlane.xlu1 %101  ;;  %v2855_v25 = vpop.xlane.xlu0 %98 }
  0x9d   :  { %v395_v55 = vsel %vm78_vm0, %v291_v2, 0.0 }
  0x9f   :  { %381 = vadd.xlane.f32.xlu1 %v380_v8  ;;  %378 = vadd.xlane.f32.xlu0 %v377_v9  ;;  %v294_v8 = vmul.f32 %v2504_v44, %v2504_v44 }
  0xa0   :  { %v2863_v28 = vpop.xlane.xlu1 %107  ;;  %v2865_v29 = vpop.xlane.xlu0 %104 }
  0xa1   :  { %v404_v46 = vsel %vm78_vm0, %v294_v8, 0.0 }
  0xa3   :  { %387 = vadd.xlane.f32.xlu1 %v386_v63  ;;  %384 = vadd.xlane.f32.xlu0 %v383_v30  ;;  %v296_v63 = vmul.f32 %v2518_v48, %v2518_v48  ;;  %v295_v30 = vmul.f32 %v2523_v49, %v2523_v49 }
  0xa4   :  { %v2873_v32 = vpop.xlane.xlu1 %113  ;;  %v2875_v33 = vpop.xlane.xlu0 %110 }
  0xa5   :  { %v410_v31 = vsel %vm78_vm0, %v296_v63, 0.0  ;;  %v407_v5 = vsel %vm78_vm0, %v295_v30, 0.0  ;;  %v304_v30 = vmul.f32 %v2574_v3, %v2574_v3 }
  0xa7   :  { %393 = vadd.xlane.f32.xlu1 %v392_v1  ;;  %390 = vadd.xlane.f32.xlu0 %v389_v14  ;;  %v298_v1 = vmul.f32 %v2532_v52, %v2532_v52  ;;  %v297_v14 = vmul.f32 %v2537_v53, %v2537_v53 }
  0xa8   :  { %v2883_v37 = vpop.xlane.xlu1 %119  ;;  %v2885_v0 = vpop.xlane.xlu0 %116 }
  0xa9   :  { %v416_v15 = vsel %vm78_vm0, %v298_v1, 0.0  ;;  %v413_v2 = vsel %vm78_vm0, %v297_v14, 0.0  ;;  %v306_v14 = vmul.f32 %v2588_v10, %v2588_v10 }
  0xab   :  { %399 = vadd.xlane.f32.xlu1 %v398_v54  ;;  %396 = vadd.xlane.f32.xlu0 %v395_v55  ;;  %v299_v54 = vmul.f32 %v2551_v57, %v2551_v57  ;;  %v422_v55 = vsel %vm78_vm0, %v300_v36, 0.0 }
  0xac   :  { %v2893_v41 = vpop.xlane.xlu1 %125  ;;  %v2895_v9 = vpop.xlane.xlu0 %122 }
  0xad   :  { %v419_v8 = vsel %vm78_vm0, %v299_v54, 0.0  ;;  %v308_v54 = vmul.f32 %v2602_v18, %v2602_v18 }
  0xaf   :  { %405 = vadd.xlane.f32.xlu1 %v404_v46  ;;  %402 = vadd.xlane.f32.xlu0 %v401_v13  ;;  %v301_v46 = vmul.f32 %v2565_v61, %v2565_v61  ;;  %v428_v13 = vsel %vm78_vm0, %v302_v40, 0.0 }
  0xb0   :  { %v2903_v44 = vpop.xlane.xlu1 %131  ;;  %v2905_v45 = vpop.xlane.xlu0 %128 }
  0xb1   :  { %v425_v63 = vsel %vm78_vm0, %v301_v46, 0.0  ;;  %v310_v46 = vmul.f32 %v2616_v26, %v2616_v26 }
  0xb3   :  { %411 = vadd.xlane.f32.xlu1 %v410_v31  ;;  %408 = vadd.xlane.f32.xlu0 %v407_v5  ;;  %v303_v31 = vmul.f32 %v2579_v4, %v2579_v4  ;;  %v434_v5 = vsel %vm78_vm0, %v304_v30, 0.0 }
  0xb4   :  { %v2913_v48 = vpop.xlane.xlu1 %137  ;;  %v2915_v49 = vpop.xlane.xlu0 %134 }
  0xb5   :  { %v431_v1 = vsel %vm78_vm0, %v303_v31, 0.0  ;;  %v312_v31 = vmul.f32 %v2630_v34, %v2630_v34 }
  0xb7   :  { %417 = vadd.xlane.f32.xlu1 %v416_v15  ;;  %414 = vadd.xlane.f32.xlu0 %v413_v2  ;;  %v305_v15 = vmul.f32 %v2593_v11, %v2593_v11  ;;  %v440_v2 = vsel %vm78_vm0, %v306_v14, 0.0 }
  0xb8   :  { %v2923_v52 = vpop.xlane.xlu1 %143  ;;  %v2925_v53 = vpop.xlane.xlu0 %140 }
  0xb9   :  { %v437_v36 = vsel %vm78_vm0, %v305_v15, 0.0  ;;  %v314_v15 = vmul.f32 %v2644_v42, %v2644_v42 }
  0xbb   :  { %423 = vadd.xlane.f32.xlu1 %v422_v55  ;;  %420 = vadd.xlane.f32.xlu0 %v419_v8  ;;  %v307_v55 = vmul.f32 %v2607_v19, %v2607_v19  ;;  %v446_v8 = vsel %vm78_vm0, %v308_v54, 0.0 }
  0xbc   :  { %v2933_v56 = vpop.xlane.xlu1 %149  ;;  %v2935_v57 = vpop.xlane.xlu0 %146 }
  0xbd   :  { %v443_v40 = vsel %vm78_vm0, %v307_v55, 0.0  ;;  %v316_v55 = vmul.f32 %v2658_v50, %v2658_v50 }
  0xbf   :  { %429 = vadd.xlane.f32.xlu1 %v428_v13  ;;  %426 = vadd.xlane.f32.xlu0 %v425_v63  ;;  %v309_v13 = vmul.f32 %v2621_v27, %v2621_v27  ;;  %v452_v63 = vsel %vm78_vm0, %v310_v46, 0.0 }
  0xc0   :  { %v2943_v60 = vpop.xlane.xlu1 %155  ;;  %v2945_v61 = vpop.xlane.xlu0 %152 }
  0xc1   :  { %v449_v30 = vsel %vm78_vm0, %v309_v13, 0.0  ;;  %v318_v13 = vmul.f32 %v2672_v58, %v2672_v58 }
  0xc3   :  { %435 = vadd.xlane.f32.xlu1 %v434_v5  ;;  %432 = vadd.xlane.f32.xlu0 %v431_v1  ;;  %v311_v5 = vmul.f32 %v2635_v35, %v2635_v35  ;;  %v458_v1 = vsel %vm78_vm0, %v312_v31, 0.0 }
  0xc4   :  { %v2953_v3 = vpop.xlane.xlu1 %161  ;;  %v2955_v4 = vpop.xlane.xlu0 %158 }
  0xc5   :  { %v455_v14 = vsel %vm78_vm0, %v311_v5, 0.0  ;;  %v320_v5 = vmul.f32 %v2686_v6, %v2686_v6 }
  0xc7   :  { %441 = vadd.xlane.f32.xlu1 %v440_v2  ;;  %438 = vadd.xlane.f32.xlu0 %v437_v36  ;;  %v313_v2 = vmul.f32 %v2649_v43, %v2649_v43  ;;  %v464_v36 = vsel %vm78_vm0, %v314_v15, 0.0 }
  0xc8   :  { %v2963_v10 = vpop.xlane.xlu1 %167  ;;  %v2965_v11 = vpop.xlane.xlu0 %164 }
  0xc9   :  { %v461_v54 = vsel %vm78_vm0, %v313_v2, 0.0  ;;  %v322_v2 = vmul.f32 %v2700_v22, %v2700_v22 }
  0xcb   :  { %447 = vadd.xlane.f32.xlu1 %v446_v8  ;;  %444 = vadd.xlane.f32.xlu0 %v443_v40  ;;  %v315_v8 = vmul.f32 %v2663_v51, %v2663_v51  ;;  %v470_v40 = vsel %vm78_vm0, %v316_v55, 0.0 }
  0xcc   :  { %v2973_v18 = vpop.xlane.xlu1 %173  ;;  %v2975_v19 = vpop.xlane.xlu0 %170 }
  0xcd   :  { %v467_v46 = vsel %vm78_vm0, %v315_v8, 0.0  ;;  %v324_v8 = vmul.f32 %v2714_v38, %v2714_v38 }
  0xcf   :  { %453 = vadd.xlane.f32.xlu1 %v452_v63  ;;  %450 = vadd.xlane.f32.xlu0 %v449_v30  ;;  %v317_v63 = vmul.f32 %v2677_v59, %v2677_v59  ;;  %v476_v30 = vsel %vm78_vm0, %v318_v13, 0.0 }
  0xd0   :  { %v2983_v26 = vpop.xlane.xlu1 %179  ;;  %v2985_v27 = vpop.xlane.xlu0 %176 }
  0xd1   :  { %v473_v31 = vsel %vm78_vm0, %v317_v63, 0.0  ;;  %v4874_v63 = vld [vmem:[#allocation2_spill] sm:$0xff] }
  0xd3   :  { %459 = vadd.xlane.f32.xlu1 %v458_v1  ;;  %456 = vadd.xlane.f32.xlu0 %v455_v14  ;;  %v319_v1 = vmul.f32 %v2691_v7, %v2691_v7  ;;  %v482_v14 = vsel %vm78_vm0, %v320_v5, 0.0 }
  0xd4   :  { %v2993_v34 = vpop.xlane.xlu1 %185  ;;  %v2995_v35 = vpop.xlane.xlu0 %182 }
  0xd5   :  { %v479_v15 = vsel %vm78_vm0, %v319_v1, 0.0 }
  0xd7   :  { %465 = vadd.xlane.f32.xlu1 %v464_v36  ;;  %462 = vadd.xlane.f32.xlu0 %v461_v54  ;;  %v321_v36 = vmul.f32 %v2705_v23, %v2705_v23  ;;  %v488_v54 = vsel %vm78_vm0, %v322_v2, 0.0 }
  0xd8   :  { %v3003_v42 = vpop.xlane.xlu1 %191  ;;  %v3005_v43 = vpop.xlane.xlu0 %188 }
  0xd9   :  { %v485_v55 = vsel %vm78_vm0, %v321_v36, 0.0  ;;  %v4877_v36 = vld [vmem:[#allocation5_spill] sm:$0xff] }
  0xdb   :  { %471 = vadd.xlane.f32.xlu1 %v470_v40  ;;  %468 = vadd.xlane.f32.xlu0 %v467_v46  ;;  %v323_v40 = vmul.f32 %v2719_v39, %v2719_v39  ;;  %v494_v46 = vsel %vm78_vm0, %v324_v8, 0.0 }
  0xdc   :  { %v3013_v50 = vpop.xlane.xlu1 %197  ;;  %v3015_v51 = vpop.xlane.xlu0 %194 }
  0xdd   :  { %v491_v13 = vsel %vm78_vm0, %v323_v40, 0.0 }
  0xdf   :  { %477 = vadd.xlane.f32.xlu1 %v476_v30  ;;  %474 = vadd.xlane.f32.xlu0 %v473_v31  ;;  %v326_v30 = vmul.f32 %v4874_v63, %v4874_v63  ;;  %v4875_v31 = vld [vmem:[#allocation3_spill] sm:$0xff] }
  0xe0   :  { %v3023_v58 = vpop.xlane.xlu1 %203  ;;  %v3025_v59 = vpop.xlane.xlu0 %200  ;;  %v325_v5 = vmul.f32 %v4875_v31, %v4875_v31 }
  0xe1   :  { %v500_v1 = vsel %vm78_vm0, %v326_v30, 0.0  ;;  %v4880_v30 = vld [vmem:[#allocation7_spill] sm:$0xff] }
  0xe2   :  { %v329_v31 = vmul.f32 %v4880_v30, %v4880_v30 }
  0xe3   :  { %483 = vadd.xlane.f32.xlu1 %v482_v14  ;;  %480 = vadd.xlane.f32.xlu0 %v479_v15  ;;  %v497_v14 = vsel %vm78_vm0, %v325_v5, 0.0  ;;  %v4876_v15 = vld [vmem:[#allocation4_spill] sm:$0xff] }
  0xe4   :  { %v3033_v6 = vpop.xlane.xlu1 %209  ;;  %v3035_v7 = vpop.xlane.xlu0 %206  ;;  %v328_v2 = vmul.f32 %v4876_v15, %v4876_v15  ;;  %v509_v15 = vsel %vm78_vm0, %v329_v31, 0.0  ;;  %v4887_v31 = vld [vmem:[#allocation10_spill] sm:$0xff] }
  0xe6   :  { %v506_v40 = vsel %vm78_vm0, %v328_v2, 0.0 }
  0xe7   :  { %489 = vadd.xlane.f32.xlu1 %v488_v54  ;;  %486 = vadd.xlane.f32.xlu0 %v485_v55  ;;  %v327_v54 = vmul.f32 %v4877_v36, %v4877_v36  ;;  %v4883_v36 = vld [vmem:[#allocation8_spill] sm:$0xff] }
  0xe8   :  { %v3043_v22 = vpop.xlane.xlu1 %215  ;;  %v3045_v23 = vpop.xlane.xlu0 %212  ;;  %v332_v2 = vmul.f32 %v4883_v36, %v4883_v36 }
  0xeb   :  { %495 = vadd.xlane.f32.xlu1 %v494_v46  ;;  %492 = vadd.xlane.f32.xlu0 %v491_v13  ;;  %v503_v46 = vsel %vm78_vm0, %v327_v54, 0.0  ;;  %v4879_v13 = vld [vmem:[#allocation6_spill] sm:$0xff]  ;;  %v4884_v54 = vld [vmem:[#allocation9_spill] sm:$0xff] }
  0xec   :  { %v3053_v38 = vpop.xlane.xlu1 %221  ;;  %v3055_v39 = vpop.xlane.xlu0 %218  ;;  %v330_v63 = vmul.f32 %v4879_v13, %v4879_v13 }
  0xef   :  { %501 = vadd.xlane.f32.xlu1 %v500_v1  ;;  %498 = vadd.xlane.f32.xlu0 %v497_v14  ;;  %v512_v14 = vsel %vm78_vm0, %v330_v63, 0.0  ;;  %v334_v63 = vmul.f32 %v2784_v47, %v2784_v47 }
  0xf0   :  { %v3063_v55 = vpop.xlane.xlu1 %227  ;;  %v3065_v8 = vpop.xlane.xlu0 %224 }
  0xf1   :  { %4878 = vst [vmem:[#allocation2_spill] sm:$0xff] %v3065_v8  ;;  %v331_v8 = vmul.f32 %v4884_v54, %v4884_v54 }
  0xf3   :  { %507 = vadd.xlane.f32.xlu1 %v506_v40  ;;  %504 = vadd.xlane.f32.xlu0 %v503_v46  ;;  %v518_v46 = vsel %vm78_vm0, %v332_v2, 0.0  ;;  %v515_v30 = vsel %vm78_vm0, %v331_v8, 0.0 }
  0xf4   :  { %v3073_v5 = vpop.xlane.xlu1 %233  ;;  %v3075_v1 = vpop.xlane.xlu0 %230 }
  0xf5   :  { %4881 = vst [vmem:[#allocation3_spill] sm:$0xff] %v3073_v5  ;;  %4882 = vst [vmem:[#allocation4_spill] sm:$0xff] %v3075_v1  ;;  %v333_v1 = vmul.f32 %v4887_v31, %v4887_v31  ;;  %v3112_v31 = vmul.f32 0.020408163, %v2825_v12 }
  0xf7   :  { %513 = vadd.xlane.f32.xlu1 %v512_v14  ;;  %510 = vadd.xlane.f32.xlu0 %v509_v15  ;;  %v524_v15 = vsel %vm78_vm0, %v334_v63, 0.0  ;;  %v521_v54 = vsel %vm78_vm0, %v333_v1, 0.0  ;;  %4896 = vst [vmem:[#allocation15_spill] sm:$0xff] %v3112_v31 }
  0xf8   :  { %v3083_v13 = vpop.xlane.xlu1 %239  ;;  %v3085_v40 = vpop.xlane.xlu0 %236 }
  0xf9   :  { %4885 = vst [vmem:[#allocation5_spill] sm:$0xff] %v3083_v13  ;;  %4886 = vst [vmem:[#allocation6_spill] sm:$0xff] %v3085_v40 }
  0xfb   :  { %519 = vadd.xlane.f32.xlu1 %v518_v46  ;;  %516 = vadd.xlane.f32.xlu0 %v515_v30 }
  0xfc   :  { %v3093_v36 = vpop.xlane.xlu1 %245  ;;  %v3095_v14 = vpop.xlane.xlu0 %242 }
  0xfd   :  { %4888 = vst [vmem:[#allocation7_spill] sm:$0xff] %v3093_v36  ;;  %4889 = vst [vmem:[#allocation8_spill] sm:$0xff] %v3095_v14 }
  0xff   :  { %525 = vadd.xlane.f32.xlu1 %v524_v15  ;;  %522 = vadd.xlane.f32.xlu0 %v521_v54  ;;  %v3119_v15 = vmul.f32 0.020408163, %v2835_v17  ;;  %v655_v54 = vmul.f32 %v3112_v31, %v3112_v31  ;;  %v3132_v17 = vmul.f32 0.020408163, %v2845_v21 }
 0x100   :  { %v3099_v2 = vpop.xlane.xlu1 %251  ;;  %v3101_v8 = vpop.xlane.xlu0 %248 }
 0x101   :  { %4890 = vst [vmem:[#allocation9_spill] sm:$0xff] %v3099_v2  ;;  %4891 = vst [vmem:[#allocation10_spill] sm:$0xff] %v3101_v8 }
 0x102   :  { %4901 = vst [vmem:[#allocation20_spill] sm:$0xff] %v3132_v17 }
 0x104   :  { %v3103_v47 = vpop.xlane.xlu1 %257  ;;  %v3105_v40 = vpop.xlane.xlu0 %254 }
 0x105   :  { %4892 = vst [vmem:[#allocation11_spill] sm:$0xff] %v3103_v47  ;;  %4893 = vst [vmem:[#allocation12_spill] sm:$0xff] %v3105_v40  ;;  %v3124_v40 = vmul.f32 0.020408163, %v2833_v16 }
 0x107   :  { %4899 = vst [vmem:[#allocation18_spill] sm:$0xff] %v3124_v40  ;;  %v658_v36 = vmul.f32 %v3124_v40, %v3124_v40 }
 0x108   :  { %v3107_v46 = vpop.xlane.xlu1 %263  ;;  %v3109_v30 = vpop.xlane.xlu0 %260 }
 0x109   :  { %4894 = vst [vmem:[#allocation13_spill] sm:$0xff] %v3107_v46  ;;  %4895 = vst [vmem:[#allocation14_spill] sm:$0xff] %v3109_v30  ;;  %v656_v30 = vmul.f32 %v3119_v15, %v3119_v15 }
 0x10c   :  { %v3114_v63 = vpop.xlane.xlu1 %269  ;;  %v3116_v1 = vpop.xlane.xlu0 %266 }
 0x10d   :  { %4897 = vst [vmem:[#allocation16_spill] sm:$0xff] %v3114_v63  ;;  %4898 = vst [vmem:[#allocation17_spill] sm:$0xff] %v3116_v1  ;;  %v3129_v63 = vmul.f32 0.020408163, %v2823_v62  ;;  %v3139_v62 = vmul.f32 0.020408163, %v2843_v20 }
 0x10e   :  { %v3146_v20 = vmul.f32 0.020408163, %v2855_v25 }
 0x10f   :  { %4900 = vst [vmem:[#allocation19_spill] sm:$0xff] %v3129_v63  ;;  %4902 = vst [vmem:[#allocation21_spill] sm:$0xff] %v3139_v62 }
 0x110   :  { %v340_v8 = vpop.xlane.xlu1 %339  ;;  %v337_v47 = vpop.xlane.xlu0 %336  ;;  %4903 = vst [vmem:[#allocation22_spill] sm:$0xff] %v3146_v20  ;;  %v661_v25 = vmul.f32 %v3146_v20, %v3146_v20  ;;  %v3170_v20 = vmul.f32 0.020408163, %v2865_v29 }
 0x111   :  { %v592_v12 = vmul.f32 0.020408163, %v340_v8  ;;  %v591_v46 = vmul.f32 0.020408163, %v337_v47  ;;  %v657_v8 = vmul.f32 %v3129_v63, %v3129_v63  ;;  %v660_v63 = vmul.f32 %v3139_v62, %v3139_v62 }
 0x112   :  { %4906 = vst [vmem:[#allocation25_spill] sm:$0xff] %v3170_v20 }
 0x113   :  { %v720_v1 = vsub.f32 %v592_v12, %v656_v30  ;;  %v719_v14 = vsub.f32 %v591_v46, %v655_v54  ;;  %v659_v12 = vmul.f32 %v3132_v17, %v3132_v17 }
 0x114   :  { %v346_v2 = vpop.xlane.xlu1 %345  ;;  %v343_v31 = vpop.xlane.xlu0 %342 }
 0x115   :  { %v784_v16 = vadd.f32 1e-05, %v720_v1  ;;  %v783_v13 = vadd.f32 1e-05, %v719_v14  ;;  %v594_v5 = vmul.f32 0.020408163, %v346_v2 }
 0x116   :  { %v593_v47 = vmul.f32 0.020408163, %v343_v31 }
 0x117   :  { %2134 = vrsqrt.f32 %v784_v16  ;;  %v722_v46 = vsub.f32 %v594_v5, %v658_v36  ;;  %v3149_v36 = vmul.f32 0.020408163, %v2863_v28  ;;  %v911_v28 = vld [vmem:[%s4780_s1] sm:$0xff] }
 0x118   :  { %2136 = vrsqrt.f32 %v783_v13  ;;  %v721_v21 = vsub.f32 %v593_v47, %v657_v8  ;;  %v352_v30 = vpop.xlane.xlu1 %351  ;;  %v349_v54 = vpop.xlane.xlu0 %348 }
 0x119   :  { %v596_v40 = vmul.f32 0.020408163, %v352_v30  ;;  %v595_v1 = vmul.f32 0.020408163, %v349_v54  ;;  %v786_v14 = vadd.f32 1e-05, %v722_v46 }
 0x11a   :  { %v785_v2 = vadd.f32 1e-05, %v721_v21  ;;  %4904 = vst [vmem:[#allocation23_spill] sm:$0xff] %v3149_v36  ;;  %v912_v46 = vld [vmem:[%s4780_s1 + $0x8] sm:$0xff]  ;;  %v3155_v21 = vmul.f32 0.020408163, %v2853_v24 }
 0x11b   :  { %v723_v31 = vsub.f32 %v595_v1, %v659_v12  ;;  %v724_v16 = vsub.f32 %v596_v40, %v660_v63  ;;  %v664_v63 = vmul.f32 %v3149_v36, %v3149_v36  ;;  %v3165_v12 = vmul.f32 0.020408163, %v2873_v32 }
 0x11c   :  { %2138 = vrsqrt.f32 %v785_v2  ;;  %v358_v5 = vpop.xlane.xlu1 %357  ;;  %v355_v13 = vpop.xlane.xlu0 %354  ;;  %4905 = vst [vmem:[#allocation24_spill] sm:$0xff] %v3155_v21  ;;  %v662_v36 = vmul.f32 %v3155_v21, %v3155_v21  ;;  %v3177_v32 = vmul.f32 0.020408163, %v2883_v37  ;;  %v3191_v21 = vmul.f32 0.020408163, %v2875_v33 }
 0x11d   :  { %2140 = vrsqrt.f32 %v786_v14  ;;  %v787_v8 = vadd.f32 1e-05, %v723_v31  ;;  %v597_v47 = vmul.f32 0.020408163, %v355_v13  ;;  %v788_v1 = vadd.f32 1e-05, %v724_v16 }
 0x11e   :  { %v598_v2 = vmul.f32 0.020408163, %v358_v5  ;;  %4907 = vst [vmem:[#allocation26_spill] sm:$0xff] %v3177_v32  ;;  %v913_v5 = vld [vmem:[%s4780_s1 + $0x10] sm:$0xff]  ;;  %v666_v29 = vmul.f32 %v3165_v12, %v3165_v12  ;;  %4908 = vst [vmem:[#allocation27_spill] sm:$0xff] %v3191_v21 }
 0x11f   :  { %2142 = vrsqrt.f32 %v787_v8  ;;  %v725_v31 = vsub.f32 %v597_v47, %v661_v25 }
 0x120   :  { %v364_v30 = vpop.xlane.xlu1 %363  ;;  %v361_v54 = vpop.xlane.xlu0 %360  ;;  %2144 = vrsqrt.f32 %v788_v1  ;;  %v726_v37 = vsub.f32 %v598_v2, %v662_v36  ;;  %v914_v36 = vld [vmem:[%s4780_s1 + $0x18] sm:$0xff]  ;;  %v3199_v1 = vmul.f32 0.020408163, %v2893_v41  ;;  %v3210_v41 = vmul.f32 0.020408163, %v2903_v44 }
 0x121   :  { %v2135_v40 = vpop.eup %2134  ;;  %v600_v14 = vmul.f32 0.020408163, %v364_v30 }
 0x122   :  { %v2137_v24 = vpop.eup %2136  ;;  %v3167_v13 = vmul.f32 %v2135_v40, %v912_v46  ;;  %v599_v46 = vmul.f32 0.020408163, %v361_v54  ;;  %v663_v40 = vmul.f32 %v3170_v20, %v3170_v20  ;;  %4909 = vst [vmem:[#allocation28_spill] sm:$0xff] %v3199_v1  ;;  %v665_v20 = vmul.f32 %v3191_v21, %v3191_v21  ;;  %4911 = vst [vmem:[#allocation30_spill] sm:$0xff] %v3210_v41 }
 0x123   :  { %v728_v17 = vsub.f32 %v600_v14, %v664_v63  ;;  %v3172_v62 = vmul.f32 %v2137_v24, %v911_v28  ;;  %v789_v28 = vadd.f32 1e-05, %v725_v31 }
 0x124   :  { %v370_v16 = vpop.xlane.xlu1 %369  ;;  %1238 = vperm.xlu1 %2133, %v3167_v13   ;;  %v367_v8 = vpop.xlane.xlu0 %366  ;;  %v727_v2 = vsub.f32 %v599_v46, %v663_v40 }
 0x125   :  { %v792_v47 = vadd.f32 1e-05, %v728_v17  ;;  %v602_v25 = vmul.f32 0.020408163, %v370_v16  ;;  %1233 = vperm.xlu0 %2132, %v3172_v62   ;;  %v668_v17 = vmul.f32 %v3177_v32, %v3177_v32  ;;  %v601_v33 = vmul.f32 0.020408163, %v367_v8 }
 0x126   :  { %v2139_v30 = vpop.eup %2138  ;;  %v3207_v32 = vmul.f32 0.020408163, %v2885_v0  ;;  %v915_v8 = vld [vmem:[%s4780_s1 + $0x20] sm:$0xff] }
 0x127   :  { %2146 = vrsqrt.f32 %v792_v47  ;;  %v730_v63 = vsub.f32 %v602_v25, %v666_v29  ;;  %v3188_v14 = vmul.f32 %v2139_v30, %v913_v5  ;;  %v2141_v24 = vpop.eup %2140  ;;  %v790_v29 = vadd.f32 1e-05, %v726_v37 }
 0x128   :  { %v376_v54 = vpop.xlane.xlu1 %375  ;;  %v373_v16 = vpop.xlane.xlu0 %372  ;;  %2148 = vrsqrt.f32 %v789_v28  ;;  %v3202_v25 = vmul.f32 %v2141_v24, %v914_v36  ;;  %4910 = vst [vmem:[#allocation29_spill] sm:$0xff] %v3207_v32  ;;  %v670_v37 = vmul.f32 %v3199_v1, %v3199_v1  ;;  %v791_v28 = vadd.f32 1e-05, %v727_v2  ;;  %v920_v36 = vld [vmem:[%s4780_s1 + $0x48] sm:$0xff] }
 0x129   :  { %v794_v31 = vadd.f32 1e-05, %v730_v63  ;;  %v604_v5 = vmul.f32 0.020408163, %v376_v54  ;;  %1243 = vperm.xlu1 %2133, %v3188_v14   ;;  %v2143_v30 = vpop.eup %2142  ;;  %v729_v0 = vsub.f32 %v601_v33, %v665_v20  ;;  %v3226_v2 = vmul.f32 0.020408163, %v2895_v9 }
 0x12a   :  { %v3218_v54 = vmul.f32 %v2143_v30, %v915_v8  ;;  %v916_v33 = vld [vmem:[%s4780_s1 + $0x28] sm:$0xff]  ;;  %v3234_v30 = vmul.f32 0.020408163, %v2913_v48  ;;  %v922_v48 = vld [vmem:[%s4780_s1 + $0x58] sm:$0xff] }
 0x12b   :  { %2150 = vrsqrt.f32 %v794_v31  ;;  %v732_v47 = vsub.f32 %v604_v5, %v668_v17  ;;  %v603_v17 = vmul.f32 0.020408163, %v373_v16  ;;  %v2145_v31 = vpop.eup %2144  ;;  %v667_v5 = vmul.f32 %v3207_v32, %v3207_v32  ;;  %4912 = vst [vmem:[#allocation31_spill] sm:$0xff] %v3226_v2 }
 0x12c   :  { %v382_v46 = vpop.xlane.xlu1 %381  ;;  %v379_v40 = vpop.xlane.xlu0 %378  ;;  %2152 = vrsqrt.f32 %v790_v29  ;;  %v672_v29 = vmul.f32 %v3210_v41, %v3210_v41  ;;  %4913 = vst [vmem:[#allocation32_spill] sm:$0xff] %v3234_v30  ;;  %v793_v9 = vadd.f32 1e-05, %v729_v0  ;;  %v3240_v32 = vmul.f32 0.020408163, %v2905_v45 }
 0x12d   :  { %v796_v63 = vadd.f32 1e-05, %v732_v47  ;;  %v606_v24 = vmul.f32 0.020408163, %v382_v46  ;;  %1248 = vperm.xlu1 %2133, %v3202_v25   ;;  %v3242_v41 = vmul.f32 %v2145_v31, %v916_v33  ;;  %v3250_v0 = vmul.f32 0.020408163, %v2923_v52 }
 0x12e   :  { %4914 = vst [vmem:[#allocation33_spill] sm:$0xff] %v3240_v32  ;;  %v674_v31 = vmul.f32 %v3234_v30, %v3234_v30 }
 0x12f   :  { %2154 = vrsqrt.f32 %v796_v63  ;;  %v734_v44 = vsub.f32 %v606_v24, %v670_v37  ;;  %v731_v37 = vsub.f32 %v603_v17, %v667_v5  ;;  %v605_v63 = vmul.f32 0.020408163, %v379_v40  ;;  %4915 = vst [vmem:[#allocation34_spill] sm:$0xff] %v3250_v0  ;;  %v917_v17 = vld [vmem:[%s4780_s1 + $0x30] sm:$0xff] }
 0x130   :  { %v388_v20 = vpop.xlane.xlu1 %387  ;;  %v385_v16 = vpop.xlane.xlu0 %384  ;;  %2156 = vrsqrt.f32 %v791_v28 }
 0x131   :  { %v2147_v47 = vpop.eup %2146  ;;  %v798_v46 = vadd.f32 1e-05, %v734_v44  ;;  %v608_v8 = vmul.f32 0.020408163, %v388_v20  ;;  %1253 = vperm.xlu1 %2133, %v3218_v54   ;;  %v669_v44 = vmul.f32 %v3226_v2, %v3226_v2  ;;  %v795_v52 = vadd.f32 1e-05, %v731_v37 }
 0x132   :  { %v3237_v24 = vmul.f32 %v2147_v47, %v920_v36  ;;  %v2149_v28 = vpop.eup %2148 }
 0x133   :  { %2158 = vrsqrt.f32 %v798_v46  ;;  %v736_v21 = vsub.f32 %v608_v8, %v672_v29  ;;  %v607_v29 = vmul.f32 0.020408163, %v385_v16  ;;  %v733_v33 = vsub.f32 %v605_v63, %v669_v44 }
 0x134   :  { %v394_v40 = vpop.xlane.xlu1 %393  ;;  %1278 = vperm.xlu0 %2132, %v3237_v24   ;;  %v391_v45 = vpop.xlane.xlu0 %390  ;;  %2160 = vrsqrt.f32 %v793_v9  ;;  %v671_v46 = vmul.f32 %v3240_v32, %v3240_v32  ;;  %v3263_v2 = vmul.f32 %v2149_v28, %v917_v17  ;;  %v676_v9 = vmul.f32 %v3250_v0, %v3250_v0 }
 0x135   :  { %v2151_v36 = vpop.eup %2150  ;;  %v800_v5 = vadd.f32 1e-05, %v736_v21  ;;  %v610_v20 = vmul.f32 0.020408163, %v394_v40  ;;  %1258 = vperm.xlu1 %2133, %v3242_v41   ;;  %v924_v21 = vld [vmem:[%s4780_s1 + $0x68] sm:$0xff] }
 0x136   :  { %v3259_v47 = vmul.f32 %v2151_v36, %v922_v48  ;;  %v2153_v16 = vpop.eup %2152  ;;  %v3269_v40 = vmul.f32 0.020408163, %v2915_v49  ;;  %v918_v48 = vld [vmem:[%s4780_s1 + $0x38] sm:$0xff]  ;;  %v3278_v44 = vmul.f32 0.020408163, %v2933_v56  ;;  %v735_v17 = vsub.f32 %v607_v29, %v671_v46 }
 0x137   :  { %2162 = vrsqrt.f32 %v800_v5  ;;  %v738_v8 = vsub.f32 %v610_v20, %v674_v31  ;;  %v797_v49 = vadd.f32 1e-05, %v733_v33  ;;  %v609_v5 = vmul.f32 0.020408163, %v391_v45  ;;  %v926_v56 = vld [vmem:[%s4780_s1 + $0x78] sm:$0xff] }
 0x138   :  { %4916 = vst [vmem:[#allocation35_spill] sm:$0xff] %v3269_v40  ;;  %v400_v37 = vpop.xlane.xlu1 %399  ;;  %1288 = vperm.xlu0 %2132, %v3259_v47   ;;  %v397_v63 = vpop.xlane.xlu0 %396  ;;  %4917 = vst [vmem:[#allocation36_spill] sm:$0xff] %v3278_v44  ;;  %2164 = vrsqrt.f32 %v795_v52  ;;  %v3283_v30 = vmul.f32 %v2153_v16, %v918_v48  ;;  %v673_v29 = vmul.f32 %v3269_v40, %v3269_v40  ;;  %v3291_v46 = vmul.f32 0.020408163, %v2925_v53  ;;  %v928_v40 = vld [vmem:[%s4780_s1 + $0x88] sm:$0xff] }
 0x139   :  { %v2155_v28 = vpop.eup %2154  ;;  %v802_v36 = vadd.f32 1e-05, %v738_v8  ;;  %v612_v31 = vmul.f32 0.020408163, %v400_v37  ;;  %1263 = vperm.xlu1 %2133, %v3263_v2   ;;  %v3294_v52 = vmul.f32 0.020408163, %v2943_v60  ;;  %v678_v16 = vmul.f32 %v3278_v44, %v3278_v44 }
 0x13a   :  { %v3281_v20 = vmul.f32 %v2155_v28, %v924_v21  ;;  %v2157_v32 = vpop.eup %2156  ;;  %4918 = vst [vmem:[#allocation37_spill] sm:$0xff] %v3291_v46  ;;  %v919_v8 = vld [vmem:[%s4780_s1 + $0x40] sm:$0xff]  ;;  %v737_v53 = vsub.f32 %v609_v5, %v673_v29  ;;  %v611_v60 = vmul.f32 0.020408163, %v397_v63  ;;  %v3322_v29 = vmul.f32 0.020408163, %v2953_v3 }
 0x13b   :  { %2166 = vrsqrt.f32 %v802_v36  ;;  %v740_v0 = vsub.f32 %v612_v31, %v676_v9  ;;  %4919 = vst [vmem:[#allocation38_spill] sm:$0xff] %v3294_v52  ;;  %v799_v9 = vadd.f32 1e-05, %v735_v17  ;;  %v3305_v31 = vmul.f32 %v2157_v32, %v919_v8  ;;  %v921_v32 = vld [vmem:[%s4780_s1 + $0x50] sm:$0xff]  ;;  %v930_v3 = vld [vmem:[%s4780_s1 + $0x98] sm:$0xff] }
 0x13c   :  { %v406_v45 = vpop.xlane.xlu1 %405  ;;  %1298 = vperm.xlu0 %2132, %v3281_v20   ;;  %v403_v33 = vpop.xlane.xlu0 %402  ;;  %2168 = vrsqrt.f32 %v797_v49  ;;  %v3313_v17 = vmul.f32 0.020408163, %v2935_v57  ;;  %v680_v63 = vmul.f32 %v3294_v52, %v3294_v52  ;;  %4921 = vst [vmem:[#allocation40_spill] sm:$0xff] %v3322_v29  ;;  %v801_v57 = vadd.f32 1e-05, %v737_v53 }
 0x13d   :  { %v2159_v21 = vpop.eup %2158  ;;  %v804_v37 = vadd.f32 1e-05, %v740_v0  ;;  %v614_v48 = vmul.f32 0.020408163, %v406_v45  ;;  %1268 = vperm.xlu1 %2133, %v3283_v30   ;;  %v675_v0 = vmul.f32 %v3291_v46, %v3291_v46  ;;  %v3338_v53 = vmul.f32 0.020408163, %v2963_v10 }
 0x13e   :  { %v3303_v28 = vmul.f32 %v2159_v21, %v926_v56  ;;  %v2161_v1 = vpop.eup %2160  ;;  %4920 = vst [vmem:[#allocation39_spill] sm:$0xff] %v3313_v17 }
 0x13f   :  { %2170 = vrsqrt.f32 %v804_v37  ;;  %v742_v36 = vsub.f32 %v614_v48, %v678_v16  ;;  %v739_v21 = vsub.f32 %v611_v60, %v675_v0  ;;  %v613_v16 = vmul.f32 0.020408163, %v403_v33  ;;  %4923 = vst [vmem:[#allocation42_spill] sm:$0xff] %v3338_v53 }
 0x140   :  { %v412_v49 = vpop.xlane.xlu1 %411  ;;  %1308 = vperm.xlu0 %2132, %v3303_v28   ;;  %v409_v5 = vpop.xlane.xlu0 %408  ;;  %2172 = vrsqrt.f32 %v799_v9  ;;  %v3328_v48 = vmul.f32 0.020408163, %v2945_v61  ;;  %v3330_v52 = vmul.f32 %v2161_v1, %v921_v32  ;;  %v923_v1 = vld [vmem:[%s4780_s1 + $0x60] sm:$0xff]  ;;  %v682_v60 = vmul.f32 %v3322_v29, %v3322_v29 }
 0x141   :  { %v2163_v56 = vpop.eup %2162  ;;  %v806_v45 = vadd.f32 1e-05, %v742_v36  ;;  %v616_v8 = vmul.f32 0.020408163, %v412_v49  ;;  %1273 = vperm.xlu1 %2133, %v3305_v31   ;;  %v677_v36 = vmul.f32 %v3313_v17, %v3313_v17  ;;  %v803_v10 = vadd.f32 1e-05, %v739_v21 }
 0x142   :  { %v3325_v37 = vmul.f32 %v2163_v56, %v928_v40  ;;  %4922 = vst [vmem:[#allocation41_spill] sm:$0xff] %v3328_v48  ;;  %v2165_v9 = vpop.eup %2164 }
 0x143   :  { %2174 = vrsqrt.f32 %v806_v45  ;;  %v744_v46 = vsub.f32 %v616_v8, %v680_v63  ;;  %v615_v63 = vmul.f32 0.020408163, %v409_v5  ;;  %v741_v32 = vsub.f32 %v613_v16, %v677_v36 }
 0x144   :  { %v418_v40 = vpop.xlane.xlu1 %417  ;;  %1318 = vperm.xlu0 %2132, %v3325_v37   ;;  %v415_v61 = vpop.xlane.xlu0 %414  ;;  %2176 = vrsqrt.f32 %v801_v57  ;;  %v679_v45 = vmul.f32 %v3328_v48, %v3328_v48  ;;  %v3351_v17 = vmul.f32 %v2165_v9, %v923_v1  ;;  %v684_v57 = vmul.f32 %v3338_v53, %v3338_v53 }
 0x145   :  { %v2167_v33 = vpop.eup %2166  ;;  %v808_v0 = vadd.f32 1e-05, %v744_v46  ;;  %v618_v49 = vmul.f32 0.020408163, %v418_v40  ;;  %1283 = vperm.xlu1 %2133, %v3330_v52   ;;  %v932_v46 = vld [vmem:[%s4780_s1 + $0xa8] sm:$0xff] }
 0x146   :  { %v3347_v56 = vmul.f32 %v2167_v33, %v930_v3  ;;  %v2169_v5 = vpop.eup %2168  ;;  %v3357_v40 = vmul.f32 0.020408163, %v2955_v4  ;;  %v925_v3 = vld [vmem:[%s4780_s1 + $0x70] sm:$0xff]  ;;  %v3366_v36 = vmul.f32 0.020408163, %v2973_v18  ;;  %v743_v1 = vsub.f32 %v615_v63, %v679_v45  ;;  %v934_v18 = vld [vmem:[%s4780_s1 + $0xb8] sm:$0xff] }
 0x147   :  { %2178 = vrsqrt.f32 %v808_v0  ;;  %v746_v8 = vsub.f32 %v618_v49, %v682_v60  ;;  %v805_v4 = vadd.f32 1e-05, %v741_v32  ;;  %v617_v0 = vmul.f32 0.020408163, %v415_v61 }
 0x148   :  { %4924 = vst [vmem:[#allocation43_spill] sm:$0xff] %v3357_v40  ;;  %v424_v21 = vpop.xlane.xlu1 %423  ;;  %1328 = vperm.xlu0 %2132, %v3347_v56   ;;  %v421_v16 = vpop.xlane.xlu0 %420  ;;  %4925 = vst [vmem:[#allocation44_spill] sm:$0xff] %v3366_v36  ;;  %2180 = vrsqrt.f32 %v803_v10  ;;  %v3371_v29 = vmul.f32 %v2169_v5, %v925_v3  ;;  %v681_v63 = vmul.f32 %v3357_v40, %v3357_v40  ;;  %v3379_v45 = vmul.f32 0.020408163, %v2965_v11  ;;  %v936_v40 = vld [vmem:[%s4780_s1 + $0xc8] sm:$0xff] }
 0x149   :  { %v2171_v9 = vpop.eup %2170  ;;  %v810_v33 = vadd.f32 1e-05, %v746_v8  ;;  %v620_v60 = vmul.f32 0.020408163, %v424_v21  ;;  %1293 = vperm.xlu1 %2133, %v3351_v17   ;;  %v3382_v10 = vmul.f32 0.020408163, %v2983_v26  ;;  %v686_v5 = vmul.f32 %v3366_v36, %v3366_v36 }
 0x14a   :  { %v3369_v49 = vmul.f32 %v2171_v9, %v932_v46  ;;  %v2173_v48 = vpop.eup %2172  ;;  %4926 = vst [vmem:[#allocation45_spill] sm:$0xff] %v3379_v45  ;;  %v927_v8 = vld [vmem:[%s4780_s1 + $0x80] sm:$0xff]  ;;  %v745_v11 = vsub.f32 %v617_v0, %v681_v63  ;;  %v619_v26 = vmul.f32 0.020408163, %v421_v16  ;;  %v3410_v63 = vmul.f32 0.020408163, %v2993_v34 }
 0x14b   :  { %2182 = vrsqrt.f32 %v810_v33  ;;  %v748_v53 = vsub.f32 %v620_v60, %v684_v57  ;;  %4927 = vst [vmem:[#allocation46_spill] sm:$0xff] %v3382_v10  ;;  %v807_v57 = vadd.f32 1e-05, %v743_v1  ;;  %v3393_v60 = vmul.f32 %v2173_v48, %v927_v8  ;;  %v929_v48 = vld [vmem:[%s4780_s1 + $0x90] sm:$0xff]  ;;  %v938_v34 = vld [vmem:[%s4780_s1 + $0xd8] sm:$0xff] }
 0x14c   :  { %v430_v61 = vpop.xlane.xlu1 %429  ;;  %1338 = vperm.xlu0 %2132, %v3369_v49   ;;  %v427_v32 = vpop.xlane.xlu0 %426  ;;  %2184 = vrsqrt.f32 %v805_v4  ;;  %v3401_v1 = vmul.f32 0.020408163, %v2975_v19  ;;  %v688_v16 = vmul.f32 %v3382_v10, %v3382_v10  ;;  %4929 = vst [vmem:[#allocation48_spill] sm:$0xff] %v3410_v63  ;;  %v809_v19 = vadd.f32 1e-05, %v745_v11 }
 0x14d   :  { %v2175_v46 = vpop.eup %2174  ;;  %v812_v21 = vadd.f32 1e-05, %v748_v53  ;;  %v622_v3 = vmul.f32 0.020408163, %v430_v61  ;;  %1303 = vperm.xlu1 %2133, %v3371_v29   ;;  %v683_v53 = vmul.f32 %v3379_v45, %v3379_v45  ;;  %v3426_v11 = vmul.f32 0.020408163, %v3003_v42 }
 0x14e   :  { %v3391_v9 = vmul.f32 %v2175_v46, %v934_v18  ;;  %v2177_v44 = vpop.eup %2176  ;;  %4928 = vst [vmem:[#allocation47_spill] sm:$0xff] %v3401_v1 }
 0x14f   :  { %2186 = vrsqrt.f32 %v812_v21  ;;  %v750_v33 = vsub.f32 %v622_v3, %v686_v5  ;;  %v747_v46 = vsub.f32 %v619_v26, %v683_v53  ;;  %v621_v5 = vmul.f32 0.020408163, %v427_v32  ;;  %4931 = vst [vmem:[#allocation50_spill] sm:$0xff] %v3426_v11 }
 0x150   :  { %v436_v4 = vpop.xlane.xlu1 %435  ;;  %1348 = vperm.xlu0 %2132, %v3391_v9   ;;  %v433_v0 = vpop.xlane.xlu0 %432  ;;  %2188 = vrsqrt.f32 %v807_v57  ;;  %v3416_v3 = vmul.f32 0.020408163, %v2985_v27  ;;  %v3418_v10 = vmul.f32 %v2177_v44, %v929_v48  ;;  %v931_v44 = vld [vmem:[%s4780_s1 + $0xa0] sm:$0xff]  ;;  %v690_v26 = vmul.f32 %v3410_v63, %v3410_v63 }
 0x151   :  { %v2179_v18 = vpop.eup %2178  ;;  %v814_v61 = vadd.f32 1e-05, %v750_v33  ;;  %v624_v8 = vmul.f32 0.020408163, %v436_v4  ;;  %1313 = vperm.xlu1 %2133, %v3393_v60   ;;  %v685_v33 = vmul.f32 %v3401_v1, %v3401_v1  ;;  %v811_v42 = vadd.f32 1e-05, %v747_v46 }
 0x152   :  { %v3413_v21 = vmul.f32 %v2179_v18, %v936_v40  ;;  %4930 = vst [vmem:[#allocation49_spill] sm:$0xff] %v3416_v3  ;;  %v2181_v57 = vpop.eup %2180 }
 0x153   :  { %2190 = vrsqrt.f32 %v814_v61  ;;  %v752_v45 = vsub.f32 %v624_v8, %v688_v16  ;;  %v623_v16 = vmul.f32 0.020408163, %v433_v0  ;;  %v749_v48 = vsub.f32 %v621_v5, %v685_v33 }
 0x154   :  { %v442_v40 = vpop.xlane.xlu1 %441  ;;  %1358 = vperm.xlu0 %2132, %v3413_v21   ;;  %v439_v27 = vpop.xlane.xlu0 %438  ;;  %2192 = vrsqrt.f32 %v809_v19  ;;  %v687_v61 = vmul.f32 %v3416_v3, %v3416_v3  ;;  %v3439_v1 = vmul.f32 %v2181_v57, %v931_v44  ;;  %v692_v19 = vmul.f32 %v3426_v11, %v3426_v11 }
 0x155   :  { %v2183_v32 = vpop.eup %2182  ;;  %v816_v53 = vadd.f32 1e-05, %v752_v45  ;;  %v626_v4 = vmul.f32 0.020408163, %v442_v40  ;;  %1323 = vperm.xlu1 %2133, %v3418_v10   ;;  %v940_v45 = vld [vmem:[%s4780_s1 + $0xe8] sm:$0xff] }
 0x156   :  { %v3435_v18 = vmul.f32 %v2183_v32, %v938_v34  ;;  %v2185_v0 = vpop.eup %2184  ;;  %v3445_v40 = vmul.f32 0.020408163, %v2995_v35  ;;  %v933_v34 = vld [vmem:[%s4780_s1 + $0xb0] sm:$0xff]  ;;  %v3454_v33 = vmul.f32 0.020408163, %v3013_v50  ;;  %v751_v44 = vsub.f32 %v623_v16, %v687_v61  ;;  %v942_v50 = vld [vmem:[%s4780_s1 + $0xf8] sm:$0xff] }
 0x157   :  { %2194 = vrsqrt.f32 %v816_v53  ;;  %v754_v8 = vsub.f32 %v626_v4, %v690_v26  ;;  %v813_v35 = vadd.f32 1e-05, %v749_v48  ;;  %v625_v53 = vmul.f32 0.020408163, %v439_v27 }
 0x158   :  { %4932 = vst [vmem:[#allocation51_spill] sm:$0xff] %v3445_v40  ;;  %v448_v46 = vpop.xlane.xlu1 %447  ;;  %1368 = vperm.xlu0 %2132, %v3435_v18   ;;  %v445_v5 = vpop.xlane.xlu0 %444  ;;  %4933 = vst [vmem:[#allocation52_spill] sm:$0xff] %v3454_v33  ;;  %2196 = vrsqrt.f32 %v811_v42  ;;  %v3459_v63 = vmul.f32 %v2185_v0, %v933_v34  ;;  %v689_v16 = vmul.f32 %v3445_v40, %v3445_v40  ;;  %v3467_v61 = vmul.f32 0.020408163, %v3005_v43  ;;  %v944_v40 = vld [vmem:[%s4780_s1 + $0x108] sm:$0xff] }
 0x159   :  { %v2187_v57 = vpop.eup %2186  ;;  %v818_v32 = vadd.f32 1e-05, %v754_v8  ;;  %v628_v26 = vmul.f32 0.020408163, %v448_v46  ;;  %1333 = vperm.xlu1 %2133, %v3439_v1   ;;  %v3470_v42 = vmul.f32 0.020408163, %v3023_v58  ;;  %v694_v0 = vmul.f32 %v3454_v33, %v3454_v33 }
 0x15a   :  { %v3457_v4 = vmul.f32 %v2187_v57, %v940_v45  ;;  %v2189_v3 = vpop.eup %2188  ;;  %4934 = vst [vmem:[#allocation53_spill] sm:$0xff] %v3467_v61  ;;  %v935_v8 = vld [vmem:[%s4780_s1 + $0xc0] sm:$0xff]  ;;  %v753_v43 = vsub.f32 %v625_v53, %v689_v16  ;;  %v627_v58 = vmul.f32 0.020408163, %v445_v5  ;;  %v3498_v16 = vmul.f32 0.020408163, %v3033_v6 }
 0x15b   :  { %2198 = vrsqrt.f32 %v818_v32  ;;  %v756_v11 = vsub.f32 %v628_v26, %v692_v19  ;;  %4935 = vst [vmem:[#allocation54_spill] sm:$0xff] %v3470_v42  ;;  %v815_v19 = vadd.f32 1e-05, %v751_v44  ;;  %v3481_v26 = vmul.f32 %v2189_v3, %v935_v8  ;;  %v937_v3 = vld [vmem:[%s4780_s1 + $0xd0] sm:$0xff]  ;;  %v946_v6 = vld [vmem:[%s4780_s1 + $0x118] sm:$0xff] }
 0x15c   :  { %v454_v27 = vpop.xlane.xlu1 %453  ;;  %1378 = vperm.xlu0 %2132, %v3457_v4   ;;  %v451_v48 = vpop.xlane.xlu0 %450  ;;  %2200 = vrsqrt.f32 %v813_v35  ;;  %v3489_v44 = vmul.f32 0.020408163, %v3015_v51  ;;  %v696_v5 = vmul.f32 %v3470_v42, %v3470_v42  ;;  %4937 = vst [vmem:[#allocation56_spill] sm:$0xff] %v3498_v16  ;;  %v817_v51 = vadd.f32 1e-05, %v753_v43 }
 0x15d   :  { %v2191_v45 = vpop.eup %2190  ;;  %v820_v46 = vadd.f32 1e-05, %v756_v11  ;;  %v630_v34 = vmul.f32 0.020408163, %v454_v27  ;;  %1343 = vperm.xlu1 %2133, %v3459_v63   ;;  %v691_v11 = vmul.f32 %v3467_v61, %v3467_v61  ;;  %v3514_v43 = vmul.f32 0.020408163, %v3043_v22 }
 0x15e   :  { %v3479_v57 = vmul.f32 %v2191_v45, %v942_v50  ;;  %v2193_v36 = vpop.eup %2192  ;;  %4936 = vst [vmem:[#allocation55_spill] sm:$0xff] %v3489_v44 }
 0x15f   :  { %2202 = vrsqrt.f32 %v820_v46  ;;  %v758_v32 = vsub.f32 %v630_v34, %v694_v0  ;;  %v755_v45 = vsub.f32 %v627_v58, %v691_v11  ;;  %v629_v0 = vmul.f32 0.020408163, %v451_v48  ;;  %4939 = vst [vmem:[#allocation58_spill] sm:$0xff] %v3514_v43 }
 0x160   :  { %v460_v35 = vpop.xlane.xlu1 %459  ;;  %1388 = vperm.xlu0 %2132, %v3479_v57   ;;  %v457_v53 = vpop.xlane.xlu0 %456  ;;  %2204 = vrsqrt.f32 %v815_v19  ;;  %v3504_v34 = vmul.f32 0.020408163, %v3025_v59  ;;  %v3506_v42 = vmul.f32 %v2193_v36, %v937_v3  ;;  %v939_v36 = vld [vmem:[%s4780_s1 + $0xe0] sm:$0xff]  ;;  %v698_v58 = vmul.f32 %v3498_v16, %v3498_v16 }
 0x161   :  { %v2195_v50 = vpop.eup %2194  ;;  %v822_v27 = vadd.f32 1e-05, %v758_v32  ;;  %v632_v8 = vmul.f32 0.020408163, %v460_v35  ;;  %1353 = vperm.xlu1 %2133, %v3481_v26   ;;  %v693_v32 = vmul.f32 %v3489_v44, %v3489_v44  ;;  %v819_v22 = vadd.f32 1e-05, %v755_v45 }
 0x162   :  { %v3501_v46 = vmul.f32 %v2195_v50, %v944_v40  ;;  %4938 = vst [vmem:[#allocation57_spill] sm:$0xff] %v3504_v34  ;;  %v2197_v19 = vpop.eup %2196 }
 0x163   :  { %2206 = vrsqrt.f32 %v822_v27  ;;  %v760_v61 = vsub.f32 %v632_v8, %v696_v5  ;;  %v631_v5 = vmul.f32 0.020408163, %v457_v53  ;;  %v757_v3 = vsub.f32 %v629_v0, %v693_v32 }
 0x164   :  { %v466_v40 = vpop.xlane.xlu1 %465  ;;  %1398 = vperm.xlu0 %2132, %v3501_v46   ;;  %v463_v59 = vpop.xlane.xlu0 %462  ;;  %2208 = vrsqrt.f32 %v817_v51  ;;  %v695_v27 = vmul.f32 %v3504_v34, %v3504_v34  ;;  %v3527_v44 = vmul.f32 %v2197_v19, %v939_v36  ;;  %v700_v51 = vmul.f32 %v3514_v43, %v3514_v43 }
 0x165   :  { %v2199_v48 = vpop.eup %2198  ;;  %v824_v11 = vadd.f32 1e-05, %v760_v61  ;;  %v634_v35 = vmul.f32 0.020408163, %v466_v40  ;;  %1363 = vperm.xlu1 %2133, %v3506_v42   ;;  %v948_v61 = vld [vmem:[%s4780_s1 + $0x128] sm:$0xff] }
 0x166   :  { %v3523_v50 = vmul.f32 %v2199_v48, %v946_v6  ;;  %v2201_v53 = vpop.eup %2200  ;;  %v3533_v40 = vmul.f32 0.020408163, %v3035_v7  ;;  %v941_v6 = vld [vmem:[%s4780_s1 + $0xf0] sm:$0xff]  ;;  %v3542_v32 = vmul.f32 0.020408163, %v3053_v38  ;;  %v759_v36 = vsub.f32 %v631_v5, %v695_v27  ;;  %v950_v38 = vld [vmem:[%s4780_s1 + $0x138] sm:$0xff] }
 0x167   :  { %2210 = vrsqrt.f32 %v824_v11  ;;  %v762_v8 = vsub.f32 %v634_v35, %v698_v58  ;;  %v821_v7 = vadd.f32 1e-05, %v757_v3  ;;  %v633_v11 = vmul.f32 0.020408163, %v463_v59 }
 0x168   :  { %4940 = vst [vmem:[#allocation59_spill] sm:$0xff] %v3533_v40  ;;  %v472_v45 = vpop.xlane.xlu1 %471  ;;  %1408 = vperm.xlu0 %2132, %v3523_v50   ;;  %v469_v0 = vpop.xlane.xlu0 %468  ;;  %4941 = vst [vmem:[#allocation60_spill] sm:$0xff] %v3542_v32  ;;  %2212 = vrsqrt.f32 %v819_v22  ;;  %v3547_v16 = vmul.f32 %v2201_v53, %v941_v6  ;;  %v697_v5 = vmul.f32 %v3533_v40, %v3533_v40  ;;  %v3555_v27 = vmul.f32 0.020408163, %v3045_v23  ;;  %v952_v40 = vld [vmem:[%s4780_s1 + $0x148] sm:$0xff] }
 0x169   :  { %v2203_v19 = vpop.eup %2202  ;;  %v826_v48 = vadd.f32 1e-05, %v762_v8  ;;  %v636_v58 = vmul.f32 0.020408163, %v472_v45  ;;  %1373 = vperm.xlu1 %2133, %v3527_v44   ;;  %v3558_v22 = vmul.f32 0.020408163, %v3063_v55  ;;  %v702_v53 = vmul.f32 %v3542_v32, %v3542_v32 }
 0x16a   :  { %v3545_v35 = vmul.f32 %v2203_v19, %v948_v61  ;;  %v2205_v34 = vpop.eup %2204  ;;  %4942 = vst [vmem:[#allocation61_spill] sm:$0xff] %v3555_v27  ;;  %v943_v8 = vld [vmem:[%s4780_s1 + $0x100] sm:$0xff]  ;;  %v761_v23 = vsub.f32 %v633_v11, %v697_v5  ;;  %v635_v55 = vmul.f32 0.020408163, %v469_v0  ;;  %v4947_v5 = vld [vmem:[#allocation3_spill] sm:$0xff] }
 0x16b   :  { %2214 = vrsqrt.f32 %v826_v48  ;;  %v764_v43 = vsub.f32 %v636_v58, %v700_v51  ;;  %4943 = vst [vmem:[#allocation62_spill] sm:$0xff] %v3558_v22  ;;  %v823_v51 = vadd.f32 1e-05, %v759_v36  ;;  %v3569_v58 = vmul.f32 %v2205_v34, %v943_v8  ;;  %v945_v34 = vld [vmem:[%s4780_s1 + $0x110] sm:$0xff] }
 0x16c   :  { %v478_v59 = vpop.xlane.xlu1 %477  ;;  %1418 = vperm.xlu0 %2132, %v3545_v35   ;;  %v475_v3 = vpop.xlane.xlu0 %474  ;;  %2216 = vrsqrt.f32 %v821_v7  ;;  %v3577_v36 = vmul.f32 0.020408163, %v3055_v39  ;;  %v704_v0 = vmul.f32 %v3558_v22, %v3558_v22  ;;  %v825_v39 = vadd.f32 1e-05, %v761_v23  ;;  %v4953_v23 = vld [vmem:[#allocation5_spill] sm:$0xff] }
 0x16d   :  { %v2207_v61 = vpop.eup %2206  ;;  %v828_v45 = vadd.f32 1e-05, %v764_v43  ;;  %v638_v6 = vmul.f32 0.020408163, %v478_v59  ;;  %1383 = vperm.xlu1 %2133, %v3547_v16   ;;  %4945 = vst [vmem:[#allocation64_spill] sm:$0xff] %v3569_v58  ;;  %v699_v43 = vmul.f32 %v3555_v27, %v3555_v27  ;;  %v4950_v27 = vld [vmem:[#allocation2_spill] sm:$0xff] }
 0x16e   :  { %v3567_v19 = vmul.f32 %v2207_v61, %v950_v38  ;;  %v2209_v33 = vpop.eup %2208  ;;  %4946 = vst [vmem:[#allocation65_spill] sm:$0xff] %v3577_v36  ;;  %v3586_v59 = vmul.f32 0.020408163, %v4947_v5  ;;  %v3592_v22 = vmul.f32 0.020408163, %v4950_v27 }
 0x16f   :  { %2218 = vrsqrt.f32 %v828_v45  ;;  %v766_v48 = vsub.f32 %v638_v6, %v702_v53  ;;  %v763_v53 = vsub.f32 %v635_v55, %v699_v43  ;;  %v637_v45 = vmul.f32 0.020408163, %v475_v3 }
 0x170   :  { %4944 = vst [vmem:[#allocation63_spill] sm:$0xff] %v3567_v19  ;;  %v484_v7 = vpop.xlane.xlu1 %483  ;;  %1428 = vperm.xlu0 %2132, %v3567_v19   ;;  %v481_v11 = vpop.xlane.xlu0 %480  ;;  %4948 = vst [vmem:[#allocation3_spill] sm:$0xff] %v3586_v59  ;;  %2220 = vrsqrt.f32 %v823_v51  ;;  %v3594_v19 = vmul.f32 %v2209_v33, %v945_v34  ;;  %v954_v51 = vld [vmem:[%s4780_s1 + $0x158] sm:$0xff]  ;;  %v3602_v55 = vmul.f32 0.020408163, %v4953_v23  ;;  %v947_v33 = vld [vmem:[%s4780_s1 + $0x120] sm:$0xff]  ;;  %v706_v43 = vmul.f32 %v3586_v59, %v3586_v59 }
 0x171   :  { %v2211_v38 = vpop.eup %2210  ;;  %v830_v8 = vadd.f32 1e-05, %v766_v48  ;;  %v640_v61 = vmul.f32 0.020408163, %v484_v7  ;;  %1393 = vperm.xlu1 %2133, %v3569_v58   ;;  %4951 = vst [vmem:[#allocation2_spill] sm:$0xff] %v3592_v22  ;;  %v701_v7 = vmul.f32 %v3577_v36, %v3577_v36  ;;  %v703_v23 = vmul.f32 %v3592_v22, %v3592_v22 }
 0x172   :  { %v3589_v6 = vmul.f32 %v2211_v38, %v952_v40  ;;  %4952 = vst [vmem:[#allocation67_spill] sm:$0xff] %v3594_v19  ;;  %v2213_v48 = vpop.eup %2212  ;;  %4954 = vst [vmem:[#allocation5_spill] sm:$0xff] %v3602_v55  ;;  %v639_v34 = vmul.f32 0.020408163, %v481_v11  ;;  %v827_v5 = vadd.f32 1e-05, %v763_v53 }
 0x173   :  { %2222 = vrsqrt.f32 %v830_v8  ;;  %v768_v32 = vsub.f32 %v640_v61, %v704_v0  ;;  %v765_v8 = vsub.f32 %v637_v45, %v701_v7  ;;  %v4959_v7 = vld [vmem:[#allocation7_spill] sm:$0xff] }
 0x174   :  { %4949 = vst [vmem:[#allocation66_spill] sm:$0xff] %v3589_v6  ;;  %v490_v40 = vpop.xlane.xlu1 %489  ;;  %1438 = vperm.xlu0 %2132, %v3589_v6   ;;  %v487_v27 = vpop.xlane.xlu0 %486  ;;  %2224 = vrsqrt.f32 %v825_v39  ;;  %v3615_v6 = vmul.f32 %v2213_v48, %v947_v33  ;;  %v708_v39 = vmul.f32 %v3602_v55, %v3602_v55  ;;  %v3630_v33 = vmul.f32 0.020408163, %v4959_v7  ;;  %v958_v7 = vld [vmem:[%s4780_s1 + $0x178] sm:$0xff] }
 0x175   :  { %v2215_v3 = vpop.eup %2214  ;;  %v832_v0 = vadd.f32 1e-05, %v768_v32  ;;  %v642_v38 = vmul.f32 0.020408163, %v490_v40  ;;  %1403 = vperm.xlu1 %2133, %v3594_v19   ;;  %v956_v32 = vld [vmem:[%s4780_s1 + $0x168] sm:$0xff]  ;;  %v4957_v40 = vld [vmem:[#allocation4_spill] sm:$0xff] }
 0x176   :  { %v3611_v61 = vmul.f32 %v2215_v3, %v954_v51  ;;  %4956 = vst [vmem:[#allocation69_spill] sm:$0xff] %v3615_v6  ;;  %v2217_v11 = vpop.eup %2216  ;;  %v3621_v59 = vmul.f32 0.020408163, %v4957_v40  ;;  %v949_v51 = vld [vmem:[%s4780_s1 + $0x130] sm:$0xff]  ;;  %4960 = vst [vmem:[#allocation7_spill] sm:$0xff] %v3630_v33  ;;  %v767_v3 = vsub.f32 %v639_v34, %v703_v23  ;;  %v4963_v34 = vld [vmem:[#allocation6_spill] sm:$0xff] }
 0x177   :  { %2226 = vrsqrt.f32 %v832_v0  ;;  %v770_v36 = vsub.f32 %v642_v38, %v706_v43  ;;  %v829_v38 = vadd.f32 1e-05, %v765_v8  ;;  %v641_v40 = vmul.f32 0.020408163, %v487_v27 }
 0x178   :  { %4955 = vst [vmem:[#allocation68_spill] sm:$0xff] %v3611_v61  ;;  %4958 = vst [vmem:[#allocation4_spill] sm:$0xff] %v3621_v59  ;;  %v496_v53 = vpop.xlane.xlu1 %495  ;;  %1448 = vperm.xlu0 %2132, %v3611_v61   ;;  %v493_v45 = vpop.xlane.xlu0 %492  ;;  %2228 = vrsqrt.f32 %v827_v5  ;;  %v3635_v19 = vmul.f32 %v2217_v11, %v949_v51  ;;  %v3643_v23 = vmul.f32 0.020408163, %v4963_v34  ;;  %v4965_v5 = vld [vmem:[#allocation9_spill] sm:$0xff]  ;;  %v951_v11 = vld [vmem:[%s4780_s1 + $0x140] sm:$0xff] }
 0x179   :  { %v2219_v48 = vpop.eup %2218  ;;  %v834_v43 = vadd.f32 1e-05, %v770_v36  ;;  %v644_v0 = vmul.f32 0.020408163, %v496_v53  ;;  %1413 = vperm.xlu1 %2133, %v3615_v6   ;;  %v705_v36 = vmul.f32 %v3621_v59, %v3621_v59  ;;  %v3646_v8 = vmul.f32 0.020408163, %v4965_v5 }
 0x17a   :  { %v3633_v22 = vmul.f32 %v2219_v48, %v956_v32  ;;  %v2221_v55 = vpop.eup %2220  ;;  %4962 = vst [vmem:[#allocation71_spill] sm:$0xff] %v3635_v19  ;;  %4964 = vst [vmem:[#allocation6_spill] sm:$0xff] %v3643_v23  ;;  %v710_v53 = vmul.f32 %v3630_v33, %v3630_v33  ;;  %v831_v51 = vadd.f32 1e-05, %v767_v3  ;;  %v643_v34 = vmul.f32 0.020408163, %v493_v45 }
 0x17b   :  { %2230 = vrsqrt.f32 %v834_v43  ;;  %v772_v61 = vsub.f32 %v644_v0, %v708_v39  ;;  %4966 = vst [vmem:[#allocation9_spill] sm:$0xff] %v3646_v8  ;;  %v769_v0 = vsub.f32 %v641_v40, %v705_v36  ;;  %v960_v6 = vld [vmem:[%s4780_s1 + $0x188] sm:$0xff]  ;;  %v4968_v3 = vld [vmem:[#allocation8_spill] sm:$0xff]  ;;  %v712_v45 = vmul.f32 %v3646_v8, %v3646_v8  ;;  %v4973_v8 = vld [vmem:[#allocation10_spill] sm:$0xff] }
 0x17c   :  { %4961 = vst [vmem:[#allocation70_spill] sm:$0xff] %v3633_v22  ;;  %v502_v27 = vpop.xlane.xlu1 %501  ;;  %1458 = vperm.xlu0 %2132, %v3633_v22   ;;  %v499_v32 = vpop.xlane.xlu0 %498  ;;  %2232 = vrsqrt.f32 %v829_v38  ;;  %v3657_v22 = vmul.f32 %v2221_v55, %v951_v11  ;;  %v953_v55 = vld [vmem:[%s4780_s1 + $0x150] sm:$0xff]  ;;  %v4970_v36 = vld [vmem:[#allocation11_spill] sm:$0xff]  ;;  %v3680_v33 = vmul.f32 0.020408163, %v4973_v8 }
 0x17d   :  { %v2223_v39 = vpop.eup %2222  ;;  %v836_v48 = vadd.f32 1e-05, %v772_v61  ;;  %v646_v43 = vmul.f32 0.020408163, %v502_v27  ;;  %1423 = vperm.xlu1 %2133, %v3635_v19   ;;  %v707_v61 = vmul.f32 %v3643_v23, %v3643_v23  ;;  %v3665_v27 = vmul.f32 0.020408163, %v4968_v3 }
 0x17e   :  { %v3655_v5 = vmul.f32 %v2223_v39, %v958_v7  ;;  %v2225_v58 = vpop.eup %2224  ;;  %v3674_v11 = vmul.f32 0.020408163, %v4970_v36  ;;  %v645_v3 = vmul.f32 0.020408163, %v499_v32  ;;  %4974 = vst [vmem:[#allocation10_spill] sm:$0xff] %v3680_v33 }
 0x17f   :  { %2234 = vrsqrt.f32 %v836_v48  ;;  %v774_v59 = vsub.f32 %v646_v43, %v710_v53  ;;  %4969 = vst [vmem:[#allocation8_spill] sm:$0xff] %v3665_v27  ;;  %v833_v48 = vadd.f32 1e-05, %v769_v0  ;;  %v771_v43 = vsub.f32 %v643_v34, %v707_v61  ;;  %v4976_v0 = vld [vmem:[#allocation13_spill] sm:$0xff] }
 0x180   :  { %4967 = vst [vmem:[#allocation72_spill] sm:$0xff] %v3655_v5  ;;  %v508_v38 = vpop.xlane.xlu1 %507  ;;  %1468 = vperm.xlu0 %2132, %v3655_v5   ;;  %v505_v40 = vpop.xlane.xlu0 %504  ;;  %4971 = vst [vmem:[#allocation11_spill] sm:$0xff] %v3674_v11  ;;  %2236 = vrsqrt.f32 %v831_v51  ;;  %v3682_v19 = vmul.f32 %v2225_v58, %v953_v55  ;;  %v962_v51 = vld [vmem:[%s4780_s1 + $0x198] sm:$0xff]  ;;  %v3690_v34 = vmul.f32 0.020408163, %v4976_v0  ;;  %v955_v58 = vld [vmem:[%s4780_s1 + $0x160] sm:$0xff]  ;;  %v714_v61 = vmul.f32 %v3674_v11, %v3674_v11 }
 0x181   :  { %v2227_v7 = vpop.eup %2226  ;;  %v838_v39 = vadd.f32 1e-05, %v774_v59  ;;  %v648_v53 = vmul.f32 0.020408163, %v508_v38  ;;  %1433 = vperm.xlu1 %2133, %v3657_v22   ;;  %v709_v38 = vmul.f32 %v3665_v27, %v3665_v27  ;;  %v647_v55 = vmul.f32 0.020408163, %v505_v40 }
 0x182   :  { %v3677_v23 = vmul.f32 %v2227_v7, %v960_v6  ;;  %4975 = vst [vmem:[#allocation74_spill] sm:$0xff] %v3682_v19  ;;  %v2229_v59 = vpop.eup %2228  ;;  %4977 = vst [vmem:[#allocation13_spill] sm:$0xff] %v3690_v34  ;;  %v835_v36 = vadd.f32 1e-05, %v771_v43  ;;  %v711_v0 = vmul.f32 %v3680_v33, %v3680_v33 }
 0x183   :  { %2238 = vrsqrt.f32 %v838_v39  ;;  %v776_v5 = vsub.f32 %v648_v53, %v712_v45  ;;  %v773_v39 = vsub.f32 %v645_v3, %v709_v38  ;;  %v957_v3 = vld [vmem:[%s4780_s1 + $0x170] sm:$0xff] }
 0x184   :  { %4972 = vst [vmem:[#allocation73_spill] sm:$0xff] %v3677_v23  ;;  %v514_v6 = vpop.xlane.xlu1 %513  ;;  %1478 = vperm.xlu0 %2132, %v3677_v23   ;;  %v511_v8 = vpop.xlane.xlu0 %510  ;;  %2240 = vrsqrt.f32 %v833_v48  ;;  %v3703_v23 = vmul.f32 %v2229_v59, %v955_v58  ;;  %v716_v48 = vmul.f32 %v3690_v34, %v3690_v34  ;;  %v4981_v59 = vld [vmem:[#allocation16_spill] sm:$0xff]  ;;  %v775_v58 = vsub.f32 %v647_v55, %v711_v0  ;;  %v4984_v55 = vld [vmem:[#allocation14_spill] sm:$0xff] }
 0x185   :  { %v2231_v32 = vpop.eup %2230  ;;  %v840_v45 = vadd.f32 1e-05, %v776_v5  ;;  %v650_v7 = vmul.f32 0.020408163, %v514_v6  ;;  %1443 = vperm.xlu1 %2133, %v3682_v19   ;;  %v964_v5 = vld [vmem:[%s4780_s1 + $0x1a8] sm:$0xff]  ;;  %v4979_v6 = vld [vmem:[#allocation12_spill] sm:$0xff] }
 0x186   :  { %v3699_v53 = vmul.f32 %v2231_v32, %v962_v51  ;;  %v2233_v40 = vpop.eup %2232  ;;  %v3709_v11 = vmul.f32 0.020408163, %v4979_v6  ;;  %v3718_v38 = vmul.f32 0.020408163, %v4981_v59  ;;  %v649_v6 = vmul.f32 0.020408163, %v511_v8 }
 0x187   :  { %2242 = vrsqrt.f32 %v840_v45  ;;  %v778_v27 = vsub.f32 %v650_v7, %v714_v61  ;;  %v837_v7 = vadd.f32 1e-05, %v773_v39  ;;  %v3723_v19 = vmul.f32 %v2233_v40, %v957_v3  ;;  %v966_v59 = vld [vmem:[%s4780_s1 + $0x1b8] sm:$0xff]  ;;  %v959_v8 = vld [vmem:[%s4780_s1 + $0x180] sm:$0xff] }
 0x188   :  { %4978 = vst [vmem:[#allocation75_spill] sm:$0xff] %v3699_v53  ;;  %4980 = vst [vmem:[#allocation12_spill] sm:$0xff] %v3709_v11  ;;  %v520_v43 = vpop.xlane.xlu1 %519  ;;  %1488 = vperm.xlu0 %2132, %v3699_v53   ;;  %v517_v45 = vpop.xlane.xlu0 %516  ;;  %2244 = vrsqrt.f32 %v835_v36  ;;  %v3731_v0 = vmul.f32 0.020408163, %v4984_v55  ;;  %v839_v40 = vadd.f32 1e-05, %v775_v58 }
 0x189   :  { %v2235_v51 = vpop.eup %2234  ;;  %4982 = vst [vmem:[#allocation16_spill] sm:$0xff] %v3718_v38  ;;  %v842_v32 = vadd.f32 1e-05, %v778_v27  ;;  %v652_v61 = vmul.f32 0.020408163, %v520_v43  ;;  %1453 = vperm.xlu1 %2133, %v3703_v23   ;;  %v713_v27 = vmul.f32 %v3709_v11, %v3709_v11  ;;  %v4985_v58 = vld [vmem:[#allocation17_spill] sm:$0xff] }
 0x18a   :  { %v3721_v33 = vmul.f32 %v2235_v51, %v964_v5  ;;  %v2237_v34 = vpop.eup %2236  ;;  %v718_v5 = vmul.f32 %v3718_v38, %v3718_v38  ;;  %v651_v51 = vmul.f32 0.020408163, %v517_v45  ;;  %v961_v45 = vld [vmem:[%s4780_s1 + $0x190] sm:$0xff] }
 0x18b   :  { %2246 = vrsqrt.f32 %v842_v32  ;;  %v780_v53 = vsub.f32 %v652_v61, %v716_v48  ;;  %v777_v3 = vsub.f32 %v649_v6, %v713_v27  ;;  %v3742_v11 = vmul.f32 %v2237_v34, %v959_v8 }
 0x18c   :  { %4983 = vst [vmem:[#allocation76_spill] sm:$0xff] %v3721_v33  ;;  %v526_v36 = vpop.xlane.xlu1 %525  ;;  %1498 = vperm.xlu0 %2132, %v3721_v33   ;;  %2248 = vrsqrt.f32 %v837_v7  ;;  %v523_v55 = vpop.xlane.xlu0 %522  ;;  %v968_v33 = vld [vmem:[%s4780_s1 + $0x1c8] sm:$0xff] }
 0x18d   :  { %v2239_v39 = vpop.eup %2238  ;;  %v844_v48 = vadd.f32 1e-05, %v780_v53  ;;  %v654_v43 = vmul.f32 0.020408163, %v526_v36  ;;  %1463 = vperm.xlu1 %2133, %v3723_v19   ;;  %v715_v53 = vmul.f32 %v3731_v0, %v3731_v0  ;;  %v3750_v36 = vmul.f32 0.020408163, %v4985_v58 }
 0x18e   :  { %v3740_v32 = vmul.f32 %v2239_v39, %v966_v59  ;;  %v2241_v38 = vpop.eup %2240  ;;  %v841_v6 = vadd.f32 1e-05, %v777_v3  ;;  %v653_v27 = vmul.f32 0.020408163, %v523_v55  ;;  %v972_v55 = vld [vmem:[%s4780_s1 + $0x1e8] sm:$0xff]  ;;  %v965_v58 = vld [vmem:[%s4780_s1 + $0x1b0] sm:$0xff] }
 0x18f   :  { %2250 = vrsqrt.f32 %v844_v48  ;;  %v782_v61 = vsub.f32 %v654_v43, %v718_v5  ;;  %v779_v59 = vsub.f32 %v651_v51, %v715_v53  ;;  %v3759_v39 = vmul.f32 %v2241_v38, %v961_v45  ;;  %v970_v5 = vld [vmem:[%s4780_s1 + $0x1d8] sm:$0xff] }
 0x190   :  { %1508 = vperm.xlu0 %2132, %v3740_v32   ;;  %2252 = vrsqrt.f32 %v839_v40  ;;  %v717_v43 = vmul.f32 %v3750_v36, %v3750_v36  ;;  %v963_v40 = vld [vmem:[%s4780_s1 + $0x1a0] sm:$0xff] }
 0x191   :  { %v2243_v7 = vpop.eup %2242  ;;  %v846_v34 = vadd.f32 1e-05, %v782_v61  ;;  %1473 = vperm.xlu1 %2133, %v3742_v11  }
 0x192   :  { %v3757_v8 = vmul.f32 %v2243_v7, %v968_v33  ;;  %v2245_v48 = vpop.eup %2244  ;;  %v843_v33 = vadd.f32 1e-05, %v779_v59  ;;  %v781_v38 = vsub.f32 %v653_v27, %v717_v43  ;;  %v974_v27 = vld [vmem:[%s4780_s1 + $0x1f8] sm:$0xff] }
 0x193   :  { %2254 = vrsqrt.f32 %v846_v34  ;;  %v3773_v61 = vmul.f32 %v2245_v48, %v963_v40  ;;  %v1104_v40 = vmul.f32 %v3167_v13, %v3119_v15 }
 0x194   :  { %1518 = vperm.xlu0 %2132, %v3757_v8   ;;  %2256 = vrsqrt.f32 %v841_v6  ;;  %v845_v7 = vadd.f32 1e-05, %v781_v38 }
 0x195   :  { %v2247_v3 = vpop.eup %2246  ;;  %1483 = vperm.xlu1 %2133, %v3759_v39   ;;  %2258 = vrsqrt.f32 %v843_v33  ;;  %v1040_v33 = vld [vmem:[%s4781_s2 + $0x8] sm:$0xff] }
 0x196   :  { %v3771_v51 = vmul.f32 %v2247_v3, %v970_v5  ;;  %v2249_v53 = vpop.eup %2248  ;;  %v967_v5 = vld [vmem:[%s4780_s1 + $0x1c0] sm:$0xff]  ;;  %2260 = vrsqrt.f32 %v845_v7  ;;  %v1042_v7 = vld [vmem:[%s4781_s2 + $0x18] sm:$0xff] }
 0x197   :  { %v3785_v59 = vmul.f32 %v2249_v53, %v965_v58  ;;  %v1168_v53 = vsub.f32 %v1040_v33, %v1104_v40  ;;  %v4986_v58 = vld [vmem:[#allocation18_spill] sm:$0xff]  ;;  %v1044_v33 = vld [vmem:[%s4781_s2 + $0x28] sm:$0xff] }
 0x198   :  { %1528 = vperm.xlu0 %2132, %v3771_v51  }
 0x199   :  { %v2251_v45 = vpop.eup %2250  ;;  %1493 = vperm.xlu1 %2133, %v3773_v61  }
 0x19a   :  { %v3783_v34 = vmul.f32 %v2251_v45, %v972_v55  ;;  %v2253_v6 = vpop.eup %2252  ;;  %v969_v55 = vld [vmem:[%s4780_s1 + $0x1d0] sm:$0xff]  ;;  %v1106_v45 = vmul.f32 %v3202_v25, %v4986_v58 }
 0x19b   :  { %v3799_v3 = vmul.f32 %v2253_v6, %v967_v5 }
 0x19c   :  { %1538 = vperm.xlu0 %2132, %v3783_v34   ;;  %v1170_v5 = vsub.f32 %v1042_v7, %v1106_v45  ;;  %v4989_v45 = vld [vmem:[#allocation24_spill] sm:$0xff] }
 0x19d   :  { %v2255_v48 = vpop.eup %2254  ;;  %1503 = vperm.xlu1 %2133, %v3785_v59  }
 0x19e   :  { %v3795_v43 = vmul.f32 %v2255_v48, %v974_v27  ;;  %v2257_v38 = vpop.eup %2256  ;;  %v971_v27 = vld [vmem:[%s4780_s1 + $0x1e0] sm:$0xff]  ;;  %v4987_v48 = vld [vmem:[#allocation21_spill] sm:$0xff] }
 0x19f   :  { %v3813_v13 = vmul.f32 %v2257_v38, %v969_v55  ;;  %v2259_v6 = vpop.eup %2258  ;;  %v1108_v25 = vmul.f32 %v3242_v41, %v4987_v48  ;;  %v1110_v41 = vmul.f32 %v3283_v30, %v4989_v45  ;;  %v4991_v30 = vld [vmem:[#allocation23_spill] sm:$0xff] }
 0x1a0   :  { %1548 = vperm.xlu0 %2132, %v3795_v43   ;;  %v3824_v40 = vmul.f32 %v2259_v6, %v971_v27  ;;  %v2261_v38 = vpop.eup %2260  ;;  %v1046_v6 = vld [vmem:[%s4781_s2 + $0x38] sm:$0xff]  ;;  %v4990_v27 = vld [vmem:[#allocation15_spill] sm:$0xff] }
 0x1a1   :  { %1513 = vperm.xlu1 %2133, %v3799_v3   ;;  %v1172_v58 = vsub.f32 %v1044_v33, %v1108_v25  ;;  %v1103_v48 = vmul.f32 %v3172_v62, %v4990_v27  ;;  %v1174_v25 = vsub.f32 %v1046_v6, %v1110_v41  ;;  %v1112_v33 = vmul.f32 %v3237_v24, %v4991_v30  ;;  %v1048_v62 = vld [vmem:[%s4781_s2 + $0x48] sm:$0xff]  ;;  %v1041_v41 = vld [vmem:[%s4781_s2 + $0x10] sm:$0xff]  ;;  %v1050_v30 = vld [vmem:[%s4781_s2 + $0x58] sm:$0xff] }
 0x1a2   :  { %v4992_v45 = vld [vmem:[#allocation19_spill] sm:$0xff]  ;;  %v1114_v24 = vmul.f32 %v3259_v47, %v3165_v12  ;;  %v4994_v12 = vld [vmem:[#allocation26_spill] sm:$0xff] }
 0x1a3   :  { %v3811_v15 = vpop.permute.xlu1 %1238  ;;  %v1176_v6 = vsub.f32 %v1048_v62, %v1112_v33  ;;  %v1043_v33 = vld [vmem:[%s4781_s2 + $0x20] sm:$0xff]  ;;  %v1116_v47 = vmul.f32 %v3281_v20, %v4994_v12  ;;  %v4996_v20 = vld [vmem:[#allocation28_spill] sm:$0xff]  ;;  %v1054_v12 = vld [vmem:[%s4781_s2 + $0x78] sm:$0xff] }
 0x1a4   :  { %1622 = vperm.xlu0 %2132, %v1168_v53   ;;  %v973_v53 = vld [vmem:[%s4780_s1 + $0x1f0] sm:$0xff] }
 0x1a5   :  { %1523 = vperm.xlu1 %2133, %v3813_v13   ;;  %v3837_v7 = vmul.f32 %v2261_v38, %v973_v53  ;;  %v3852_v38 = vpop.permute.xlu0 %1233 }
 0x1a8   :  { %v3829_v55 = vpop.permute.xlu1 %1243  ;;  %1632 = vperm.xlu0 %2132, %v1170_v5  }
 0x1a9   :  { %4988 = vst [vmem:[#allocation14_spill] sm:$0xff] %v3829_v55  ;;  %1533 = vperm.xlu1 %2133, %v3824_v40   ;;  %v1039_v55 = vld [vmem:[%s4781_s2] sm:$0xff] }
 0x1aa   :  { %v1167_v53 = vsub.f32 %v1039_v55, %v1103_v48 }
 0x1ac   :  { %v3844_v5 = vpop.permute.xlu1 %1248  ;;  %1642 = vperm.xlu0 %2132, %v1172_v58   ;;  %v1105_v58 = vmul.f32 %v3188_v14, %v4992_v45  ;;  %v4993_v14 = vld [vmem:[#allocation20_spill] sm:$0xff] }
 0x1ad   :  { %1543 = vperm.xlu1 %2133, %v3837_v7   ;;  %v1107_v45 = vmul.f32 %v3218_v54, %v4993_v14  ;;  %v4995_v54 = vld [vmem:[#allocation22_spill] sm:$0xff] }
 0x1ae   :  { %v1169_v48 = vsub.f32 %v1041_v41, %v1105_v58  ;;  %v1052_v41 = vld [vmem:[%s4781_s2 + $0x68] sm:$0xff]  ;;  %v1109_v14 = vmul.f32 %v3263_v2, %v4995_v54  ;;  %v4997_v2 = vld [vmem:[#allocation25_spill] sm:$0xff] }
 0x1af   :  { %v1171_v58 = vsub.f32 %v1043_v33, %v1107_v45  ;;  %v1111_v54 = vmul.f32 %v3305_v31, %v4997_v2  ;;  %v4999_v31 = vld [vmem:[#allocation27_spill] sm:$0xff] }
 0x1b0   :  { %v3859_v27 = vpop.permute.xlu1 %1253  ;;  %1652 = vperm.xlu0 %2132, %v1174_v25   ;;  %v1113_v2 = vmul.f32 %v3330_v52, %v4999_v31  ;;  %v5001_v52 = vld [vmem:[#allocation29_spill] sm:$0xff] }
 0x1b1   :  { %1617 = vperm.xlu1 %2133, %v1167_v53   ;;  %v1178_v53 = vsub.f32 %v1050_v30, %v1114_v24  ;;  %v1045_v24 = vld [vmem:[%s4781_s2 + $0x30] sm:$0xff]  ;;  %v1118_v30 = vmul.f32 %v3303_v28, %v4996_v20  ;;  %v4998_v28 = vld [vmem:[#allocation30_spill] sm:$0xff]  ;;  %v1056_v20 = vld [vmem:[%s4781_s2 + $0x88] sm:$0xff]  ;;  %v1115_v31 = vmul.f32 %v3351_v17, %v5001_v52 }
 0x1b2   :  { %v1173_v33 = vsub.f32 %v1045_v24, %v1109_v14  ;;  %v5003_v17 = vld [vmem:[#allocation31_spill] sm:$0xff] }
 0x1b3   :  { %v3866_v55 = vpop.permute.xlu0 %1278  ;;  %v1117_v52 = vmul.f32 %v3371_v29, %v5003_v17  ;;  %v5005_v29 = vld [vmem:[#allocation33_spill] sm:$0xff] }
 0x1b4   :  { %v3873_v25 = vpop.permute.xlu1 %1258  ;;  %1662 = vperm.xlu0 %2132, %v1176_v6   ;;  %v1119_v17 = vmul.f32 %v3393_v60, %v5005_v29  ;;  %v5007_v60 = vld [vmem:[#allocation35_spill] sm:$0xff] }
 0x1b5   :  { %1627 = vperm.xlu1 %2133, %v1169_v48   ;;  %v1180_v48 = vsub.f32 %v1052_v41, %v1116_v47  ;;  %v1047_v47 = vld [vmem:[%s4781_s2 + $0x40] sm:$0xff]  ;;  %v1120_v41 = vmul.f32 %v3325_v37, %v4998_v28  ;;  %v5000_v37 = vld [vmem:[#allocation32_spill] sm:$0xff]  ;;  %v1058_v28 = vld [vmem:[%s4781_s2 + $0x98] sm:$0xff]  ;;  %v1121_v29 = vmul.f32 %v3418_v10, %v5007_v60 }
 0x1b6   :  { %v1175_v24 = vsub.f32 %v1047_v47, %v1111_v54  ;;  %v5009_v10 = vld [vmem:[#allocation37_spill] sm:$0xff] }
 0x1b7   :  { %v3880_v62 = vpop.permute.xlu0 %1288  ;;  %v1123_v60 = vmul.f32 %v3439_v1, %v5009_v10  ;;  %v5011_v1 = vld [vmem:[#allocation39_spill] sm:$0xff] }
 0x1b8   :  { %v3887_v6 = vpop.permute.xlu1 %1263  ;;  %1672 = vperm.xlu0 %2132, %v1178_v53   ;;  %v1125_v10 = vmul.f32 %v3459_v63, %v5011_v1  ;;  %v5013_v63 = vld [vmem:[#allocation41_spill] sm:$0xff] }
 0x1b9   :  { %1637 = vperm.xlu1 %2133, %v1171_v58   ;;  %v1182_v58 = vsub.f32 %v1054_v12, %v1118_v30  ;;  %v1049_v30 = vld [vmem:[%s4781_s2 + $0x50] sm:$0xff]  ;;  %v1122_v12 = vmul.f32 %v3347_v56, %v5000_v37  ;;  %v5002_v56 = vld [vmem:[#allocation34_spill] sm:$0xff]  ;;  %v1060_v37 = vld [vmem:[%s4781_s2 + $0xa8] sm:$0xff]  ;;  %v1127_v1 = vmul.f32 %v3481_v26, %v5013_v63 }
 0x1ba   :  { %v1177_v47 = vsub.f32 %v1049_v30, %v1113_v2  ;;  %v5015_v26 = vld [vmem:[#allocation43_spill] sm:$0xff] }
 0x1bb   :  { %v3894_v45 = vpop.permute.xlu0 %1298  ;;  %v1129_v63 = vmul.f32 %v3506_v42, %v5015_v26  ;;  %v5018_v42 = vld [vmem:[#allocation45_spill] sm:$0xff] }
 0x1bc   :  { %v3901_v53 = vpop.permute.xlu1 %1268  ;;  %1682 = vperm.xlu0 %2132, %v1180_v48   ;;  %v1131_v26 = vmul.f32 %v3527_v44, %v5018_v42  ;;  %v5022_v44 = vld [vmem:[#allocation47_spill] sm:$0xff] }
 0x1bd   :  { %1647 = vperm.xlu1 %2133, %v1173_v33   ;;  %v1184_v33 = vsub.f32 %v1056_v20, %v1120_v41  ;;  %v1051_v41 = vld [vmem:[%s4781_s2 + $0x60] sm:$0xff]  ;;  %v1124_v20 = vmul.f32 %v3369_v49, %v5002_v56  ;;  %v5004_v49 = vld [vmem:[#allocation36_spill] sm:$0xff]  ;;  %v1062_v56 = vld [vmem:[%s4781_s2 + $0xb8] sm:$0xff]  ;;  %v1133_v42 = vmul.f32 %v3547_v16, %v5022_v44 }
 0x1be   :  { %v1179_v30 = vsub.f32 %v1051_v41, %v1115_v31  ;;  %v1078_v16 = vld [vmem:[%s4781_s2 + $0x138] sm:$0xff]  ;;  %v5029_v44 = vld [vmem:[#allocation66_spill] sm:$0xff] }
 0x1bf   :  { %v3908_v14 = vpop.permute.xlu0 %1308 }
 0x1c0   :  { %v3915_v48 = vpop.permute.xlu1 %1273  ;;  %1692 = vperm.xlu0 %2132, %v1182_v58  }
 0x1c1   :  { %1657 = vperm.xlu1 %2133, %v1175_v24   ;;  %v1186_v24 = vsub.f32 %v1058_v28, %v1122_v12  ;;  %v1053_v12 = vld [vmem:[%s4781_s2 + $0x70] sm:$0xff]  ;;  %v1126_v28 = vmul.f32 %v3391_v9, %v5004_v49  ;;  %v5006_v9 = vld [vmem:[#allocation38_spill] sm:$0xff]  ;;  %v1064_v49 = vld [vmem:[%s4781_s2 + $0xc8] sm:$0xff] }
 0x1c2   :  { %v1181_v41 = vsub.f32 %v1053_v12, %v1117_v52 }
 0x1c3   :  { %v3922_v54 = vpop.permute.xlu0 %1318 }
 0x1c4   :  { %v3929_v58 = vpop.permute.xlu1 %1283  ;;  %1702 = vperm.xlu0 %2132, %v1184_v33  }
 0x1c5   :  { %1667 = vperm.xlu1 %2133, %v1177_v47   ;;  %v1188_v47 = vsub.f32 %v1060_v37, %v1124_v20  ;;  %v1055_v20 = vld [vmem:[%s4781_s2 + $0x80] sm:$0xff]  ;;  %v1128_v37 = vmul.f32 %v3413_v21, %v5006_v9  ;;  %v5008_v21 = vld [vmem:[#allocation40_spill] sm:$0xff]  ;;  %v1066_v9 = vld [vmem:[%s4781_s2 + $0xd8] sm:$0xff] }
 0x1c6   :  { %v1183_v12 = vsub.f32 %v1055_v20, %v1119_v17 }
 0x1c7   :  { %v3936_v2 = vpop.permute.xlu0 %1328 }
 0x1c8   :  { %v3943_v33 = vpop.permute.xlu1 %1293  ;;  %1712 = vperm.xlu0 %2132, %v1186_v24  }
 0x1c9   :  { %1677 = vperm.xlu1 %2133, %v1179_v30   ;;  %v1190_v30 = vsub.f32 %v1062_v56, %v1126_v28  ;;  %v1057_v28 = vld [vmem:[%s4781_s2 + $0x90] sm:$0xff]  ;;  %v1130_v56 = vmul.f32 %v3435_v18, %v5008_v21  ;;  %v5010_v18 = vld [vmem:[#allocation42_spill] sm:$0xff]  ;;  %v1068_v21 = vld [vmem:[%s4781_s2 + $0xe8] sm:$0xff] }
 0x1ca   :  { %v1185_v20 = vsub.f32 %v1057_v28, %v1121_v29 }
 0x1cb   :  { %v3950_v31 = vpop.permute.xlu0 %1338 }
 0x1cc   :  { %v3957_v24 = vpop.permute.xlu1 %1303  ;;  %1722 = vperm.xlu0 %2132, %v1188_v47  }
 0x1cd   :  { %1687 = vperm.xlu1 %2133, %v1181_v41   ;;  %v1192_v41 = vsub.f32 %v1064_v49, %v1128_v37  ;;  %v1059_v37 = vld [vmem:[%s4781_s2 + $0xa0] sm:$0xff]  ;;  %v1132_v49 = vmul.f32 %v3457_v4, %v5010_v18  ;;  %v5012_v4 = vld [vmem:[#allocation44_spill] sm:$0xff]  ;;  %v1070_v18 = vld [vmem:[%s4781_s2 + $0xf8] sm:$0xff] }
 0x1ce   :  { %v1187_v28 = vsub.f32 %v1059_v37, %v1123_v60 }
 0x1cf   :  { %v3964_v52 = vpop.permute.xlu0 %1348 }
 0x1d0   :  { %v3971_v47 = vpop.permute.xlu1 %1313  ;;  %1732 = vperm.xlu0 %2132, %v1190_v30  }
 0x1d1   :  { %1697 = vperm.xlu1 %2133, %v1183_v12   ;;  %v1194_v12 = vsub.f32 %v1066_v9, %v1130_v56  ;;  %v1061_v56 = vld [vmem:[%s4781_s2 + $0xb0] sm:$0xff]  ;;  %v1134_v9 = vmul.f32 %v3479_v57, %v5012_v4  ;;  %v5014_v57 = vld [vmem:[#allocation46_spill] sm:$0xff]  ;;  %v1072_v4 = vld [vmem:[%s4781_s2 + $0x108] sm:$0xff] }
 0x1d2   :  { %v1189_v37 = vsub.f32 %v1061_v56, %v1125_v10 }
 0x1d3   :  { %v3978_v17 = vpop.permute.xlu0 %1358 }
 0x1d4   :  { %v3985_v30 = vpop.permute.xlu1 %1323  ;;  %1742 = vperm.xlu0 %2132, %v1192_v41  }
 0x1d5   :  { %1707 = vperm.xlu1 %2133, %v1185_v20   ;;  %v1196_v20 = vsub.f32 %v1068_v21, %v1132_v49  ;;  %v1063_v49 = vld [vmem:[%s4781_s2 + $0xc0] sm:$0xff]  ;;  %v1136_v21 = vmul.f32 %v3501_v46, %v5014_v57  ;;  %v5016_v46 = vld [vmem:[#allocation48_spill] sm:$0xff]  ;;  %v1074_v57 = vld [vmem:[%s4781_s2 + $0x118] sm:$0xff] }
 0x1d6   :  { %v1191_v56 = vsub.f32 %v1063_v49, %v1127_v1 }
 0x1d7   :  { %v3992_v29 = vpop.permute.xlu0 %1368 }
 0x1d8   :  { %v3999_v41 = vpop.permute.xlu1 %1333  ;;  %1752 = vperm.xlu0 %2132, %v1194_v12  }
 0x1d9   :  { %1717 = vperm.xlu1 %2133, %v1187_v28   ;;  %v1198_v28 = vsub.f32 %v1070_v18, %v1134_v9  ;;  %v1065_v9 = vld [vmem:[%s4781_s2 + $0xd0] sm:$0xff]  ;;  %v1138_v18 = vmul.f32 %v3523_v50, %v5016_v46  ;;  %v5020_v50 = vld [vmem:[#allocation50_spill] sm:$0xff]  ;;  %v1076_v46 = vld [vmem:[%s4781_s2 + $0x128] sm:$0xff] }
 0x1da   :  { %v1193_v49 = vsub.f32 %v1065_v9, %v1129_v63 }
 0x1db   :  { %v4006_v60 = vpop.permute.xlu0 %1378 }
 0x1dc   :  { %v4013_v12 = vpop.permute.xlu1 %1343  ;;  %1762 = vperm.xlu0 %2132, %v1196_v20  }
 0x1dd   :  { %1727 = vperm.xlu1 %2133, %v1189_v37   ;;  %v1200_v37 = vsub.f32 %v1072_v4, %v1136_v21  ;;  %v1067_v21 = vld [vmem:[%s4781_s2 + $0xe0] sm:$0xff]  ;;  %v1140_v4 = vmul.f32 %v3545_v35, %v5020_v50  ;;  %v5023_v35 = vld [vmem:[#allocation52_spill] sm:$0xff] }
 0x1de   :  { %v1195_v9 = vsub.f32 %v1067_v21, %v1131_v26 }
 0x1df   :  { %v4020_v10 = vpop.permute.xlu0 %1388 }
 0x1e0   :  { %v4027_v20 = vpop.permute.xlu1 %1353  ;;  %1772 = vperm.xlu0 %2132, %v1198_v28  }
 0x1e1   :  { %1737 = vperm.xlu1 %2133, %v1191_v56   ;;  %v1202_v56 = vsub.f32 %v1074_v57, %v1138_v18  ;;  %v1069_v18 = vld [vmem:[%s4781_s2 + $0xf0] sm:$0xff]  ;;  %v5024_v57 = vld [vmem:[#allocation63_spill] sm:$0xff] }
 0x1e2   :  { %v1142_v50 = vmul.f32 %v5024_v57, %v5023_v35  ;;  %v1197_v21 = vsub.f32 %v1069_v18, %v1133_v42 }
 0x1e3   :  { %v4034_v1 = vpop.permute.xlu0 %1398 }
 0x1e4   :  { %5017 = vst [vmem:[#allocation17_spill] sm:$0xff] %v4034_v1  ;;  %v4041_v28 = vpop.permute.xlu1 %1363  ;;  %1782 = vperm.xlu0 %2132, %v1200_v37  }
 0x1e5   :  { %5019 = vst [vmem:[#allocation18_spill] sm:$0xff] %v4041_v28  ;;  %1747 = vperm.xlu1 %2133, %v1193_v49   ;;  %v1204_v49 = vsub.f32 %v1076_v46, %v1140_v4  ;;  %v5026_v28 = vld [vmem:[#allocation64_spill] sm:$0xff]  ;;  %v1071_v4 = vld [vmem:[%s4781_s2 + $0x100] sm:$0xff] }
 0x1e6   :  { %v5028_v46 = vld [vmem:[#allocation54_spill] sm:$0xff] }
 0x1e7   :  { %v4048_v63 = vpop.permute.xlu0 %1408  ;;  %v1144_v35 = vmul.f32 %v5029_v44, %v5028_v46  ;;  %v5035_v46 = vld [vmem:[#allocation68_spill] sm:$0xff] }
 0x1e8   :  { %5021 = vst [vmem:[#allocation21_spill] sm:$0xff] %v4048_v63  ;;  %v4055_v37 = vpop.permute.xlu1 %1373  ;;  %1792 = vperm.xlu0 %2132, %v1202_v56   ;;  %v5025_v63 = vld [vmem:[#allocation49_spill] sm:$0xff] }
 0x1e9   :  { %1757 = vperm.xlu1 %2133, %v1195_v9   ;;  %v1135_v1 = vmul.f32 %v5026_v28, %v5025_v63  ;;  %v1206_v9 = vsub.f32 %v1078_v16, %v1142_v50  ;;  %v5031_v28 = vld [vmem:[#allocation51_spill] sm:$0xff]  ;;  %v1073_v50 = vld [vmem:[%s4781_s2 + $0x110] sm:$0xff] }
 0x1ea   :  { %v5032_v63 = vld [vmem:[#allocation67_spill] sm:$0xff]  ;;  %v5034_v16 = vld [vmem:[#allocation56_spill] sm:$0xff] }
 0x1eb   :  { %v4062_v26 = vpop.permute.xlu0 %1418  ;;  %v1199_v18 = vsub.f32 %v1071_v4, %v1135_v1  ;;  %v1137_v57 = vmul.f32 %v5032_v63, %v5031_v28  ;;  %v1146_v44 = vmul.f32 %v5035_v46, %v5034_v16  ;;  %v5037_v28 = vld [vmem:[#allocation53_spill] sm:$0xff]  ;;  %v5041_v16 = vld [vmem:[#allocation70_spill] sm:$0xff] }
 0x1ec   :  { %v4069_v56 = vpop.permute.xlu1 %1383  ;;  %1802 = vperm.xlu0 %2132, %v1204_v49   ;;  %v5038_v63 = vld [vmem:[#allocation69_spill] sm:$0xff] }
 0x1ed   :  { %5027 = vst [vmem:[#allocation24_spill] sm:$0xff] %v4069_v56  ;;  %1767 = vperm.xlu1 %2133, %v1197_v21   ;;  %v1080_v56 = vld [vmem:[%s4781_s2 + $0x148] sm:$0xff]  ;;  %v1201_v4 = vsub.f32 %v1073_v50, %v1137_v57 }
 0x1ee   :  { %v1208_v21 = vsub.f32 %v1080_v56, %v1144_v35  ;;  %v1075_v56 = vld [vmem:[%s4781_s2 + $0x120] sm:$0xff] }
 0x1ef   :  { %v4076_v42 = vpop.permute.xlu0 %1428 }
 0x1f0   :  { %5030 = vst [vmem:[#allocation15_spill] sm:$0xff] %v4076_v42  ;;  %v4083_v49 = vpop.permute.xlu1 %1393  ;;  %1812 = vperm.xlu0 %2132, %v1206_v9   ;;  %v1139_v42 = vmul.f32 %v5038_v63, %v5037_v28  ;;  %v5042_v28 = vld [vmem:[#allocation55_spill] sm:$0xff] }
 0x1f1   :  { %5033 = vst [vmem:[#allocation23_spill] sm:$0xff] %v4083_v49  ;;  %1777 = vperm.xlu1 %2133, %v1199_v18   ;;  %v1082_v49 = vld [vmem:[%s4781_s2 + $0x158] sm:$0xff]  ;;  %v5040_v18 = vld [vmem:[#allocation58_spill] sm:$0xff]  ;;  %v5043_v63 = vld [vmem:[#allocation71_spill] sm:$0xff] }
 0x1f2   :  { %v1210_v35 = vsub.f32 %v1082_v49, %v1146_v44  ;;  %v1148_v46 = vmul.f32 %v5041_v16, %v5040_v18  ;;  %v1203_v50 = vsub.f32 %v1075_v56, %v1139_v42  ;;  %v1077_v49 = vld [vmem:[%s4781_s2 + $0x130] sm:$0xff] }
 0x1f3   :  { %v4090_v1 = vpop.permute.xlu0 %1438  ;;  %v5046_v18 = vld [vmem:[#allocation72_spill] sm:$0xff] }
 0x1f4   :  { %5036 = vst [vmem:[#allocation19_spill] sm:$0xff] %v4090_v1  ;;  %v4097_v9 = vpop.permute.xlu1 %1403  ;;  %1822 = vperm.xlu0 %2132, %v1208_v21   ;;  %v1141_v1 = vmul.f32 %v5043_v63, %v5042_v28  ;;  %v5048_v28 = vld [vmem:[#allocation57_spill] sm:$0xff] }
 0x1f5   :  { %5039 = vst [vmem:[#allocation20_spill] sm:$0xff] %v4097_v9  ;;  %1787 = vperm.xlu1 %2133, %v1201_v4   ;;  %v1084_v9 = vld [vmem:[%s4781_s2 + $0x168] sm:$0xff]  ;;  %v5045_v4 = vld [vmem:[#allocation60_spill] sm:$0xff]  ;;  %v1143_v63 = vmul.f32 %v3657_v22, %v5048_v28  ;;  %v5053_v28 = vld [vmem:[#allocation74_spill] sm:$0xff] }
 0x1f6   :  { %v1212_v44 = vsub.f32 %v1084_v9, %v1148_v46  ;;  %v1150_v16 = vmul.f32 %v5046_v18, %v5045_v4  ;;  %v1205_v56 = vsub.f32 %v1077_v49, %v1141_v1  ;;  %v1079_v9 = vld [vmem:[%s4781_s2 + $0x140] sm:$0xff]  ;;  %v5051_v4 = vld [vmem:[#allocation73_spill] sm:$0xff]  ;;  %v5052_v22 = vld [vmem:[#allocation59_spill] sm:$0xff] }
 0x1f7   :  { %v4104_v57 = vpop.permute.xlu0 %1448  ;;  %v1207_v49 = vsub.f32 %v1079_v9, %v1143_v63 }
 0x1f8   :  { %v4111_v21 = vpop.permute.xlu1 %1413  ;;  %1832 = vperm.xlu0 %2132, %v1210_v35  }
 0x1f9   :  { %5044 = vst [vmem:[#allocation26_spill] sm:$0xff] %v4111_v21  ;;  %1797 = vperm.xlu1 %2133, %v1203_v50   ;;  %v1086_v21 = vld [vmem:[%s4781_s2 + $0x178] sm:$0xff]  ;;  %v5050_v50 = vld [vmem:[#allocation62_spill] sm:$0xff] }
 0x1fa   :  { %v1214_v46 = vsub.f32 %v1086_v21, %v1150_v16  ;;  %v1152_v18 = vmul.f32 %v5051_v4, %v5050_v50  ;;  %v1081_v21 = vld [vmem:[%s4781_s2 + $0x150] sm:$0xff]  ;;  %v5056_v50 = vld [vmem:[#allocation75_spill] sm:$0xff] }
 0x1fb   :  { %v4118_v42 = vpop.permute.xlu0 %1458 }
 0x1fc   :  { %5047 = vst [vmem:[#allocation22_spill] sm:$0xff] %v4118_v42  ;;  %v4125_v35 = vpop.permute.xlu1 %1423  ;;  %1842 = vperm.xlu0 %2132, %v1212_v44   ;;  %v1145_v42 = vmul.f32 %v5053_v28, %v5052_v22  ;;  %v5057_v22 = vld [vmem:[#allocation61_spill] sm:$0xff] }
 0x1fd   :  { %5049 = vst [vmem:[#allocation28_spill] sm:$0xff] %v4125_v35  ;;  %1807 = vperm.xlu1 %2133, %v1205_v56   ;;  %v1088_v35 = vld [vmem:[%s4781_s2 + $0x188] sm:$0xff]  ;;  %v1147_v28 = vmul.f32 %v3703_v23, %v5057_v22  ;;  %v5061_v23 = vld [vmem:[#allocation65_spill] sm:$0xff] }
 0x1fe   :  { %v1216_v16 = vsub.f32 %v1088_v35, %v1152_v18  ;;  %v5055_v56 = vld [vmem:[#allocation3_spill] sm:$0xff]  ;;  %v1209_v9 = vsub.f32 %v1081_v21, %v1145_v42  ;;  %v1083_v35 = vld [vmem:[%s4781_s2 + $0x160] sm:$0xff]  ;;  %v1149_v22 = vmul.f32 %v3723_v19, %v5061_v23  ;;  %v1094_v23 = vld [vmem:[%s4781_s2 + $0x1b8] sm:$0xff] }
 0x1ff   :  { %v4132_v1 = vpop.permute.xlu0 %1468  ;;  %v1154_v4 = vmul.f32 %v5056_v50, %v5055_v56  ;;  %v5060_v56 = vld [vmem:[#allocation76_spill] sm:$0xff]  ;;  %v1211_v21 = vsub.f32 %v1083_v35, %v1147_v28  ;;  %v5063_v19 = vld [vmem:[#allocation2_spill] sm:$0xff] }
 0x200   :  { %v4139_v44 = vpop.permute.xlu1 %1433  ;;  %1852 = vperm.xlu0 %2132, %v1214_v46  }
 0x201   :  { %5054 = vst [vmem:[#allocation25_spill] sm:$0xff] %v4139_v44  ;;  %1817 = vperm.xlu1 %2133, %v1207_v49   ;;  %v1090_v44 = vld [vmem:[%s4781_s2 + $0x198] sm:$0xff] }
 0x202   :  { %v1218_v18 = vsub.f32 %v1090_v44, %v1154_v4  ;;  %v5059_v49 = vld [vmem:[#allocation5_spill] sm:$0xff]  ;;  %v1085_v44 = vld [vmem:[%s4781_s2 + $0x170] sm:$0xff] }
 0x203   :  { %v4146_v63 = vpop.permute.xlu0 %1478  ;;  %v1156_v50 = vmul.f32 %v5060_v56, %v5059_v49  ;;  %v1213_v35 = vsub.f32 %v1085_v44, %v1149_v22  ;;  %v1151_v56 = vmul.f32 %v3742_v11, %v5063_v19  ;;  %v5065_v11 = vld [vmem:[#allocation4_spill] sm:$0xff]  ;;  %v1096_v19 = vld [vmem:[%s4781_s2 + $0x1c8] sm:$0xff] }
 0x204   :  { %v4153_v46 = vpop.permute.xlu1 %1443  ;;  %1862 = vperm.xlu0 %2132, %v1216_v16  }
 0x205   :  { %5058 = vst [vmem:[#allocation30_spill] sm:$0xff] %v4153_v46  ;;  %1827 = vperm.xlu1 %2133, %v1209_v9   ;;  %v1092_v46 = vld [vmem:[%s4781_s2 + $0x1a8] sm:$0xff] }
 0x206   :  { %v1220_v4 = vsub.f32 %v1092_v46, %v1156_v50  ;;  %v5062_v9 = vld [vmem:[#allocation7_spill] sm:$0xff]  ;;  %v1087_v46 = vld [vmem:[%s4781_s2 + $0x180] sm:$0xff] }
 0x207   :  { %v4160_v42 = vpop.permute.xlu0 %1488  ;;  %v1158_v49 = vmul.f32 %v3740_v32, %v5062_v9  ;;  %v5064_v32 = vld [vmem:[#allocation9_spill] sm:$0xff]  ;;  %v1215_v44 = vsub.f32 %v1087_v46, %v1151_v56  ;;  %v1153_v9 = vmul.f32 %v3759_v39, %v5065_v11  ;;  %v5067_v39 = vld [vmem:[#allocation6_spill] sm:$0xff] }
 0x208   :  { %v4167_v16 = vpop.permute.xlu1 %1453  ;;  %1872 = vperm.xlu0 %2132, %v1218_v18   ;;  %v1098_v11 = vld [vmem:[%s4781_s2 + $0x1d8] sm:$0xff] }
 0x209   :  { %1837 = vperm.xlu1 %2133, %v1211_v21   ;;  %v1222_v50 = vsub.f32 %v1094_v23, %v1158_v49  ;;  %v1160_v21 = vmul.f32 %v3757_v8, %v5064_v32  ;;  %v1089_v49 = vld [vmem:[%s4781_s2 + $0x190] sm:$0xff]  ;;  %v5066_v8 = vld [vmem:[#allocation11_spill] sm:$0xff]  ;;  %v1155_v32 = vmul.f32 %v3773_v61, %v5067_v39 }
 0x20a   :  { %v1162_v23 = vmul.f32 %v3771_v51, %v5066_v8  ;;  %v1217_v46 = vsub.f32 %v1089_v49, %v1153_v9  ;;  %v5068_v51 = vld [vmem:[#allocation13_spill] sm:$0xff]  ;;  %v5069_v61 = vld [vmem:[#allocation8_spill] sm:$0xff]  ;;  %v1100_v39 = vld [vmem:[%s4781_s2 + $0x1e8] sm:$0xff] }
 0x20b   :  { %v4174_v28 = vpop.permute.xlu0 %1498  ;;  %v1157_v8 = vmul.f32 %v3785_v59, %v5069_v61  ;;  %v5071_v59 = vld [vmem:[#allocation10_spill] sm:$0xff]  ;;  %v1102_v61 = vld [vmem:[%s4781_s2 + $0x1f8] sm:$0xff] }
 0x20c   :  { %v4181_v18 = vpop.permute.xlu1 %1463  ;;  %1882 = vperm.xlu0 %2132, %v1220_v4  }
 0x20d   :  { %1847 = vperm.xlu1 %2133, %v1213_v35   ;;  %v1224_v35 = vsub.f32 %v1096_v19, %v1160_v21  ;;  %v1091_v21 = vld [vmem:[%s4781_s2 + $0x1a0] sm:$0xff]  ;;  %v1164_v19 = vmul.f32 %v3783_v34, %v5068_v51  ;;  %v5070_v34 = vld [vmem:[#allocation16_spill] sm:$0xff]  ;;  %v1159_v51 = vmul.f32 %v3799_v3, %v5071_v59 }
 0x20e   :  { %v1219_v49 = vsub.f32 %v1091_v21, %v1155_v32 }
 0x20f   :  { %v4188_v22 = vpop.permute.xlu0 %1508 }
 0x210   :  { %v4195_v4 = vpop.permute.xlu1 %1473  ;;  %1892 = vperm.xlu0 %2132, %v1222_v50  }
 0x211   :  { %1857 = vperm.xlu1 %2133, %v1215_v44   ;;  %v1226_v44 = vsub.f32 %v1098_v11, %v1162_v23  ;;  %v1093_v23 = vld [vmem:[%s4781_s2 + $0x1b0] sm:$0xff]  ;;  %v1166_v11 = vmul.f32 %v3795_v43, %v5070_v34 }
 0x212   :  { %v1221_v21 = vsub.f32 %v1093_v23, %v1157_v8  ;;  %v5072_v8 = vld [vmem:[#allocation12_spill] sm:$0xff] }
 0x213   :  { %v4202_v56 = vpop.permute.xlu0 %1518  ;;  %v1161_v23 = vmul.f32 %v3813_v13, %v5072_v8  ;;  %v1097_v34 = vld [vmem:[%s4781_s2 + $0x1d0] sm:$0xff] }
 0x214   :  { %v4209_v50 = vpop.permute.xlu1 %1483  ;;  %1902 = vperm.xlu0 %2132, %v1224_v35  }
 0x215   :  { %1867 = vperm.xlu1 %2133, %v1217_v46   ;;  %v1228_v46 = vsub.f32 %v1100_v39, %v1164_v19  ;;  %v1095_v19 = vld [vmem:[%s4781_s2 + $0x1c0] sm:$0xff]  ;;  %v1225_v59 = vsub.f32 %v1097_v34, %v1161_v23 }
 0x216   :  { %v1223_v39 = vsub.f32 %v1095_v19, %v1159_v51  ;;  %v1163_v51 = vmul.f32 %v3824_v40, %v3731_v0  ;;  %v1099_v19 = vld [vmem:[%s4781_s2 + $0x1e0] sm:$0xff]  ;;  %v1165_v0 = vmul.f32 %v3837_v7, %v3750_v36 }
 0x217   :  { %v4216_v9 = vpop.permute.xlu0 %1528 }
 0x218   :  { %v4223_v35 = vpop.permute.xlu1 %1493  ;;  %1912 = vperm.xlu0 %2132, %v1226_v44   ;;  %v1227_v23 = vsub.f32 %v1099_v19, %v1163_v51 }
 0x219   :  { %1877 = vperm.xlu1 %2133, %v1219_v49   ;;  %v1230_v49 = vsub.f32 %v1102_v61, %v1166_v11 }
 0x21b   :  { %v4230_v32 = vpop.permute.xlu0 %1538 }
 0x21c   :  { %v4237_v44 = vpop.permute.xlu1 %1503  ;;  %1922 = vperm.xlu0 %2132, %v1228_v46   ;;  %v2262_v46 = vld [vmem:[%s4779_s0 + $0x8] sm:$0xff] }
 0x21d   :  { %1887 = vperm.xlu1 %2133, %v1221_v21   ;;  %v1552_v11 = vmul.f32 %v2262_v46, %v3811_v15  ;;  %v1101_v46 = vld [vmem:[%s4781_s2 + $0x1f0] sm:$0xff] }
 0x21f   :  { %v4242_v43 = vpop.permute.xlu0 %1548 }
 0x220   :  { %v4246_v3 = vpop.permute.xlu1 %1513  ;;  %1932 = vperm.xlu0 %2132, %v1230_v49   ;;  %v2263_v49 = vld [vmem:[%s4779_s0 + $0x18] sm:$0xff] }
 0x221   :  { %1897 = vperm.xlu1 %2133, %v1223_v39   ;;  %v1554_v39 = vmul.f32 %v2263_v49, %v3844_v5  ;;  %v2264_v5 = vld [vmem:[%s4779_s0 + $0x28] sm:$0xff] }
 0x223   :  { %v1623_v21 = vpop.permute.xlu0 %1622 }
 0x224   :  { %v4257_v13 = vpop.permute.xlu1 %1523  ;;  %v1936_v61 = vadd.f32 %v1623_v21, %v1552_v11  ;;  %v1556_v11 = vmul.f32 %v2264_v5, %v3873_v25  ;;  %v1229_v21 = vsub.f32 %v1101_v46, %v1165_v0  ;;  %v2266_v25 = vld [vmem:[%s4779_s0] sm:$0xff] }
 0x225   :  { %1907 = vperm.xlu1 %2133, %v1225_v59   ;;  %v5073_v5 = vld [vmem:[#allocation14_spill] sm:$0xff] }
 0x226   :  { %v2000_v15 = vmax.f32 %v1936_v61, 0.0  ;;  %v2265_v61 = vld [vmem:[%s4779_s0 + $0x38] sm:$0xff] }
 0x227   :  { %v1633_v8 = vpop.permute.xlu0 %1632  ;;  %v1558_v19 = vmul.f32 %v2265_v61, %v3901_v53  ;;  %v2267_v53 = vld [vmem:[%s4779_s0 + $0x48] sm:$0xff]  ;;  %v2269_v61 = vld [vmem:[%s4779_s0 + $0x58] sm:$0xff] }
 0x228   :  { %2064 = vst.msk [vmem:[%s4782_s3 + $0x8] sm:$0xff] %vm78_vm0, %v2000_v15  ;;  %v4272_v40 = vpop.permute.xlu1 %1533  ;;  %v1938_v34 = vadd.f32 %v1633_v8, %v1554_v39  ;;  %v1551_v39 = vmul.f32 %v2266_v25, %v3852_v38  ;;  %v2268_v38 = vld [vmem:[%s4779_s0 + $0x10] sm:$0xff]  ;;  %v2270_v25 = vld [vmem:[%s4779_s0 + $0x20] sm:$0xff] }
 0x229   :  { %1917 = vperm.xlu1 %2133, %v1227_v23  }
 0x22a   :  { %v2002_v36 = vmax.f32 %v1938_v34, 0.0  ;;  %v1560_v34 = vmul.f32 %v2267_v53, %v3866_v55  ;;  %v2271_v53 = vld [vmem:[%s4779_s0 + $0x68] sm:$0xff] }
 0x22b   :  { %v1643_v7 = vpop.permute.xlu0 %1642 }
 0x22c   :  { %2066 = vst.msk [vmem:[%s4782_s3 + $0x18] sm:$0xff] %vm78_vm0, %v2002_v36  ;;  %v4285_v59 = vpop.permute.xlu1 %1543  ;;  %v1940_v51 = vadd.f32 %v1643_v7, %v1556_v11  ;;  %v1553_v11 = vmul.f32 %v2268_v38, %v5073_v5 }
 0x22d   :  { %1927 = vperm.xlu1 %2133, %v1229_v21  }
 0x22e   :  { %v2004_v49 = vmax.f32 %v1940_v51, 0.0 }
 0x22f   :  { %v1653_v15 = vpop.permute.xlu0 %1652 }
 0x230   :  { %2068 = vst.msk [vmem:[%s4782_s3 + $0x28] sm:$0xff] %vm78_vm0, %v2004_v49  ;;  %v1618_v8 = vpop.permute.xlu1 %1617  ;;  %v1942_v23 = vadd.f32 %v1653_v15, %v1558_v19  ;;  %v1562_v19 = vmul.f32 %v2269_v61, %v3880_v62 }
 0x231   :  { %v1935_v0 = vadd.f32 %v1618_v8, %v1551_v39  ;;  %v1555_v39 = vmul.f32 %v2270_v25, %v3859_v27  ;;  %v1564_v27 = vmul.f32 %v2271_v53, %v3894_v45 }
 0x232   :  { %v2006_v46 = vmax.f32 %v1942_v23, 0.0 }
 0x233   :  { %v1999_v36 = vmax.f32 %v1935_v0, 0.0  ;;  %v1663_v7 = vpop.permute.xlu0 %1662 }
 0x234   :  { %2070 = vst.msk [vmem:[%s4782_s3 + $0x38] sm:$0xff] %vm78_vm0, %v2006_v46  ;;  %v1628_v21 = vpop.permute.xlu1 %1627  ;;  %v1944_v51 = vadd.f32 %v1663_v7, %v1560_v34  ;;  %v2272_v46 = vld [vmem:[%s4779_s0 + $0x30] sm:$0xff] }
 0x235   :  { %2063 = vst.msk [vmem:[%s4782_s3] sm:$0xff] %vm78_vm0, %v1999_v36  ;;  %v1937_v55 = vadd.f32 %v1628_v21, %v1553_v11  ;;  %v1557_v38 = vmul.f32 %v2272_v46, %v3887_v6  ;;  %v2273_v21 = vld [vmem:[%s4779_s0 + $0x78] sm:$0xff] }
 0x236   :  { %v2008_v49 = vmax.f32 %v1944_v51, 0.0  ;;  %v1566_v6 = vmul.f32 %v2273_v21, %v3908_v14  ;;  %v2277_v46 = vld [vmem:[%s4779_s0 + $0x98] sm:$0xff] }
 0x237   :  { %v2001_v15 = vmax.f32 %v1937_v55, 0.0  ;;  %v1673_v8 = vpop.permute.xlu0 %1672  ;;  %v2274_v55 = vld [vmem:[%s4779_s0 + $0x40] sm:$0xff] }
 0x238   :  { %2072 = vst.msk [vmem:[%s4782_s3 + $0x48] sm:$0xff] %vm78_vm0, %v2008_v49  ;;  %v1638_v23 = vpop.permute.xlu1 %1637  ;;  %v1946_v0 = vadd.f32 %v1673_v8, %v1562_v19  ;;  %v1559_v61 = vmul.f32 %v2274_v55, %v3915_v48  ;;  %v2280_v55 = vld [vmem:[%s4779_s0 + $0x70] sm:$0xff] }
 0x239   :  { %2065 = vst.msk [vmem:[%s4782_s3 + $0x10] sm:$0xff] %vm78_vm0, %v2001_v15  ;;  %v1939_v62 = vadd.f32 %v1638_v23, %v1555_v39  ;;  %v2275_v15 = vld [vmem:[%s4779_s0 + $0x88] sm:$0xff]  ;;  %v2276_v23 = vld [vmem:[%s4779_s0 + $0x50] sm:$0xff] }
 0x23a   :  { %v2010_v34 = vmax.f32 %v1946_v0, 0.0  ;;  %v1568_v48 = vmul.f32 %v2275_v15, %v3922_v54  ;;  %v1561_v0 = vmul.f32 %v2276_v23, %v3929_v58  ;;  %v1570_v58 = vmul.f32 %v2277_v46, %v3936_v2 }
 0x23b   :  { %v2003_v5 = vmax.f32 %v1939_v62, 0.0  ;;  %v1683_v11 = vpop.permute.xlu0 %1682 }
 0x23c   :  { %2074 = vst.msk [vmem:[%s4782_s3 + $0x58] sm:$0xff] %vm78_vm0, %v2010_v34  ;;  %v1648_v36 = vpop.permute.xlu1 %1647  ;;  %v1948_v7 = vadd.f32 %v1683_v11, %v1564_v27 }
 0x23d   :  { %2067 = vst.msk [vmem:[%s4782_s3 + $0x20] sm:$0xff] %vm78_vm0, %v2003_v5  ;;  %v1941_v45 = vadd.f32 %v1648_v36, %v1557_v38  ;;  %v2278_v5 = vld [vmem:[%s4779_s0 + $0x60] sm:$0xff] }
 0x23e   :  { %v2012_v51 = vmax.f32 %v1948_v7, 0.0  ;;  %v1563_v11 = vmul.f32 %v2278_v5, %v3943_v33 }
 0x23f   :  { %v2005_v19 = vmax.f32 %v1941_v45, 0.0  ;;  %v1693_v49 = vpop.permute.xlu0 %1692 }
 0x240   :  { %2076 = vst.msk [vmem:[%s4782_s3 + $0x68] sm:$0xff] %vm78_vm0, %v2012_v51  ;;  %v1658_v25 = vpop.permute.xlu1 %1657  ;;  %v1950_v39 = vadd.f32 %v1693_v49, %v1566_v6  ;;  %v2279_v6 = vld [vmem:[%s4779_s0 + $0xa8] sm:$0xff] }
 0x241   :  { %2069 = vst.msk [vmem:[%s4782_s3 + $0x30] sm:$0xff] %vm78_vm0, %v2005_v19  ;;  %v1943_v14 = vadd.f32 %v1658_v25, %v1559_v61  ;;  %v1572_v33 = vmul.f32 %v2279_v6, %v3950_v31  ;;  %v1565_v61 = vmul.f32 %v2280_v55, %v3957_v24  ;;  %v2287_v55 = vld [vmem:[%s4779_s0 + $0xe8] sm:$0xff] }
 0x242   :  { %v2014_v8 = vmax.f32 %v1950_v39, 0.0 }
 0x243   :  { %v2007_v62 = vmax.f32 %v1943_v14, 0.0  ;;  %v1703_v53 = vpop.permute.xlu0 %1702  ;;  %v2281_v14 = vld [vmem:[%s4779_s0 + $0xb8] sm:$0xff] }
 0x244   :  { %2078 = vst.msk [vmem:[%s4782_s3 + $0x78] sm:$0xff] %vm78_vm0, %v2014_v8  ;;  %v1668_v27 = vpop.permute.xlu1 %1667  ;;  %v1952_v34 = vadd.f32 %v1703_v53, %v1568_v48  ;;  %v1574_v24 = vmul.f32 %v2281_v14, %v3964_v52  ;;  %v2282_v48 = vld [vmem:[%s4779_s0 + $0x80] sm:$0xff] }
 0x245   :  { %2071 = vst.msk [vmem:[%s4782_s3 + $0x40] sm:$0xff] %vm78_vm0, %v2007_v62  ;;  %v1945_v54 = vadd.f32 %v1668_v27, %v1561_v0  ;;  %v1567_v8 = vmul.f32 %v2282_v48, %v3971_v47  ;;  %v2283_v27 = vld [vmem:[%s4779_s0 + $0xc8] sm:$0xff]  ;;  %v2290_v48 = vld [vmem:[%s4779_s0 + $0xc0] sm:$0xff] }
 0x246   :  { %v2016_v38 = vmax.f32 %v1952_v34, 0.0  ;;  %v1576_v47 = vmul.f32 %v2283_v27, %v3978_v17 }
 0x247   :  { %v2009_v36 = vmax.f32 %v1945_v54, 0.0  ;;  %v1713_v7 = vpop.permute.xlu0 %1712  ;;  %v2284_v54 = vld [vmem:[%s4779_s0 + $0x90] sm:$0xff] }
 0x248   :  { %2080 = vst.msk [vmem:[%s4782_s3 + $0x88] sm:$0xff] %vm78_vm0, %v2016_v38  ;;  %v1678_v45 = vpop.permute.xlu1 %1677  ;;  %v1954_v21 = vadd.f32 %v1713_v7, %v1570_v58  ;;  %v1569_v46 = vmul.f32 %v2284_v54, %v3985_v30  ;;  %v5075_v54 = vld [vmem:[#allocation18_spill] sm:$0xff] }
 0x249   :  { %2073 = vst.msk [vmem:[%s4782_s3 + $0x50] sm:$0xff] %vm78_vm0, %v2009_v36  ;;  %v1947_v2 = vadd.f32 %v1678_v45, %v1563_v11  ;;  %v2285_v36 = vld [vmem:[%s4779_s0 + $0xd8] sm:$0xff]  ;;  %v2286_v45 = vld [vmem:[%s4779_s0 + $0xa0] sm:$0xff] }
 0x24a   :  { %v2018_v51 = vmax.f32 %v1954_v21, 0.0  ;;  %v1578_v30 = vmul.f32 %v2285_v36, %v3992_v29  ;;  %v1571_v21 = vmul.f32 %v2286_v45, %v3999_v41  ;;  %v1580_v41 = vmul.f32 %v2287_v55, %v4006_v60  ;;  %v2293_v36 = vld [vmem:[%s4779_s0 + $0x118] sm:$0xff] }
 0x24b   :  { %v2011_v19 = vmax.f32 %v1947_v2, 0.0  ;;  %v1723_v49 = vpop.permute.xlu0 %1722 }
 0x24c   :  { %2082 = vst.msk [vmem:[%s4782_s3 + $0x98] sm:$0xff] %vm78_vm0, %v2018_v51  ;;  %v1688_v25 = vpop.permute.xlu1 %1687  ;;  %v1956_v39 = vadd.f32 %v1723_v49, %v1572_v33 }
 0x24d   :  { %2075 = vst.msk [vmem:[%s4782_s3 + $0x60] sm:$0xff] %vm78_vm0, %v2011_v19  ;;  %v1949_v31 = vadd.f32 %v1688_v25, %v1565_v61  ;;  %v2288_v19 = vld [vmem:[%s4779_s0 + $0xb0] sm:$0xff] }
 0x24e   :  { %v2020_v15 = vmax.f32 %v1956_v39, 0.0  ;;  %v1573_v49 = vmul.f32 %v2288_v19, %v4013_v12  ;;  %v2296_v19 = vld [vmem:[%s4779_s0 + $0xf0] sm:$0xff] }
 0x24f   :  { %v2013_v23 = vmax.f32 %v1949_v31, 0.0  ;;  %v1733_v0 = vpop.permute.xlu0 %1732 }
 0x250   :  { %2084 = vst.msk [vmem:[%s4782_s3 + $0xa8] sm:$0xff] %vm78_vm0, %v2020_v15  ;;  %v1698_v62 = vpop.permute.xlu1 %1697  ;;  %v1958_v53 = vadd.f32 %v1733_v0, %v1574_v24  ;;  %v2289_v24 = vld [vmem:[%s4779_s0 + $0xf8] sm:$0xff] }
 0x251   :  { %2077 = vst.msk [vmem:[%s4782_s3 + $0x70] sm:$0xff] %vm78_vm0, %v2013_v23  ;;  %v1951_v52 = vadd.f32 %v1698_v62, %v1567_v8  ;;  %v1582_v12 = vmul.f32 %v2289_v24, %v4020_v10  ;;  %v1575_v8 = vmul.f32 %v2290_v48, %v4027_v20  ;;  %v5074_v20 = vld [vmem:[#allocation17_spill] sm:$0xff] }
 0x252   :  { %v2022_v34 = vmax.f32 %v1958_v53, 0.0  ;;  %v2297_v24 = vld [vmem:[%s4779_s0 + $0x138] sm:$0xff] }
 0x253   :  { %v2015_v58 = vmax.f32 %v1951_v52, 0.0  ;;  %v1743_v38 = vpop.permute.xlu0 %1742  ;;  %v2291_v52 = vld [vmem:[%s4779_s0 + $0x108] sm:$0xff] }
 0x254   :  { %2086 = vst.msk [vmem:[%s4782_s3 + $0xb8] sm:$0xff] %vm78_vm0, %v2022_v34  ;;  %v1708_v5 = vpop.permute.xlu1 %1707  ;;  %v1960_v11 = vadd.f32 %v1743_v38, %v1576_v47  ;;  %v1584_v27 = vmul.f32 %v2291_v52, %v5074_v20  ;;  %v2292_v34 = vld [vmem:[%s4779_s0 + $0xd0] sm:$0xff] }
 0x255   :  { %2079 = vst.msk [vmem:[%s4782_s3 + $0x80] sm:$0xff] %vm78_vm0, %v2015_v58  ;;  %v1953_v17 = vadd.f32 %v1708_v5, %v1569_v46  ;;  %v1577_v46 = vmul.f32 %v2292_v34, %v5075_v54 }
 0x256   :  { %v2024_v7 = vmax.f32 %v1960_v11, 0.0 }
 0x257   :  { %v2017_v2 = vmax.f32 %v1953_v17, 0.0  ;;  %v1753_v6 = vpop.permute.xlu0 %1752 }
 0x258   :  { %2088 = vst.msk [vmem:[%s4782_s3 + $0xc8] sm:$0xff] %vm78_vm0, %v2024_v7  ;;  %v1718_v33 = vpop.permute.xlu1 %1717  ;;  %v1962_v51 = vadd.f32 %v1753_v6, %v1578_v30  ;;  %v5076_v30 = vld [vmem:[#allocation21_spill] sm:$0xff] }
 0x259   :  { %2081 = vst.msk [vmem:[%s4782_s3 + $0x90] sm:$0xff] %vm78_vm0, %v2017_v2  ;;  %v1955_v29 = vadd.f32 %v1718_v33, %v1571_v21  ;;  %v1586_v7 = vmul.f32 %v2293_v36, %v5076_v30  ;;  %v2294_v21 = vld [vmem:[%s4779_s0 + $0xe0] sm:$0xff] }
 0x25a   :  { %v2026_v61 = vmax.f32 %v1962_v51, 0.0  ;;  %v1579_v2 = vmul.f32 %v2294_v21, %v4055_v37 }
 0x25b   :  { %v2019_v25 = vmax.f32 %v1955_v29, 0.0  ;;  %v1763_v39 = vpop.permute.xlu0 %1762 }
 0x25c   :  { %2090 = vst.msk [vmem:[%s4782_s3 + $0xd8] sm:$0xff] %vm78_vm0, %v2026_v61  ;;  %v1728_v31 = vpop.permute.xlu1 %1727  ;;  %v1964_v14 = vadd.f32 %v1763_v39, %v1580_v41  ;;  %v2295_v41 = vld [vmem:[%s4779_s0 + $0x128] sm:$0xff] }
 0x25d   :  { %2083 = vst.msk [vmem:[%s4782_s3 + $0xa0] sm:$0xff] %vm78_vm0, %v2019_v25  ;;  %v1957_v60 = vadd.f32 %v1728_v31, %v1573_v49  ;;  %v1588_v37 = vmul.f32 %v2295_v41, %v4062_v26  ;;  %v5077_v49 = vld [vmem:[#allocation24_spill] sm:$0xff] }
 0x25e   :  { %v2028_v15 = vmax.f32 %v1964_v14, 0.0  ;;  %v1581_v25 = vmul.f32 %v2296_v19, %v5077_v49 }
 0x25f   :  { %v2021_v23 = vmax.f32 %v1957_v60, 0.0  ;;  %v1773_v0 = vpop.permute.xlu0 %1772 }
 0x260   :  { %2092 = vst.msk [vmem:[%s4782_s3 + $0xe8] sm:$0xff] %vm78_vm0, %v2028_v15  ;;  %v1738_v62 = vpop.permute.xlu1 %1737  ;;  %v1966_v53 = vadd.f32 %v1773_v0, %v1582_v12  ;;  %v5078_v12 = vld [vmem:[#allocation15_spill] sm:$0xff] }
 0x261   :  { %2085 = vst.msk [vmem:[%s4782_s3 + $0xb0] sm:$0xff] %vm78_vm0, %v2021_v23  ;;  %v1959_v10 = vadd.f32 %v1738_v62, %v1575_v8  ;;  %v1590_v15 = vmul.f32 %v2297_v24, %v5078_v12  ;;  %v2298_v8 = vld [vmem:[%s4779_s0 + $0x100] sm:$0xff]  ;;  %v5079_v23 = vld [vmem:[#allocation23_spill] sm:$0xff] }
 0x262   :  { %v2030_v47 = vmax.f32 %v1966_v53, 0.0  ;;  %v1583_v0 = vmul.f32 %v2298_v8, %v5079_v23  ;;  %v2306_v23 = vld [vmem:[%s4779_s0 + $0x140] sm:$0xff] }
 0x263   :  { %v2023_v58 = vmax.f32 %v1959_v10, 0.0  ;;  %v1783_v38 = vpop.permute.xlu0 %1782 }
 0x264   :  { %2094 = vst.msk [vmem:[%s4782_s3 + $0xf8] sm:$0xff] %vm78_vm0, %v2030_v47  ;;  %v1748_v5 = vpop.permute.xlu1 %1747  ;;  %v1968_v11 = vadd.f32 %v1783_v38, %v1584_v27  ;;  %v2299_v27 = vld [vmem:[%s4779_s0 + $0x148] sm:$0xff] }
 0x265   :  { %2087 = vst.msk [vmem:[%s4782_s3 + $0xc0] sm:$0xff] %vm78_vm0, %v2023_v58  ;;  %v1961_v17 = vadd.f32 %v1748_v5, %v1577_v46  ;;  %v5080_v47 = vld [vmem:[#allocation19_spill] sm:$0xff]  ;;  %v2300_v46 = vld [vmem:[%s4779_s0 + $0x110] sm:$0xff] }
 0x266   :  { %v2032_v45 = vmax.f32 %v1968_v11, 0.0  ;;  %v1592_v34 = vmul.f32 %v2299_v27, %v5080_v47  ;;  %v5081_v58 = vld [vmem:[#allocation20_spill] sm:$0xff]  ;;  %v2307_v27 = vld [vmem:[%s4779_s0 + $0x188] sm:$0xff] }
 0x267   :  { %v2025_v6 = vmax.f32 %v1961_v17, 0.0  ;;  %v1793_v33 = vpop.permute.xlu0 %1792  ;;  %v1585_v38 = vmul.f32 %v2300_v46, %v5081_v58  ;;  %v1600_v47 = vmul.f32 %v2307_v27, %v4146_v63  ;;  %v5086_v46 = vld [vmem:[#allocation30_spill] sm:$0xff] }
 0x268   :  { %2096 = vst.msk [vmem:[%s4782_s3 + $0x108] sm:$0xff] %vm78_vm0, %v2032_v45  ;;  %v1758_v51 = vpop.permute.xlu1 %1757  ;;  %v1970_v29 = vadd.f32 %v1793_v33, %v1586_v7  ;;  %v2301_v7 = vld [vmem:[%s4779_s0 + $0x158] sm:$0xff] }
 0x269   :  { %2089 = vst.msk [vmem:[%s4782_s3 + $0xd0] sm:$0xff] %vm78_vm0, %v2025_v6  ;;  %v1963_v55 = vadd.f32 %v1758_v51, %v1579_v2  ;;  %v1594_v45 = vmul.f32 %v2301_v7, %v4104_v57  ;;  %v2302_v2 = vld [vmem:[%s4779_s0 + $0x120] sm:$0xff] }
 0x26a   :  { %v2034_v61 = vmax.f32 %v1970_v29, 0.0  ;;  %v5082_v6 = vld [vmem:[#allocation26_spill] sm:$0xff] }
 0x26b   :  { %v2027_v39 = vmax.f32 %v1963_v55, 0.0  ;;  %v1803_v31 = vpop.permute.xlu0 %1802  ;;  %v1587_v33 = vmul.f32 %v2302_v2, %v5082_v6 }
 0x26c   :  { %2098 = vst.msk [vmem:[%s4782_s3 + $0x118] sm:$0xff] %vm78_vm0, %v2034_v61  ;;  %v1768_v14 = vpop.permute.xlu1 %1767  ;;  %v1972_v60 = vadd.f32 %v1803_v31, %v1588_v37  ;;  %v2303_v37 = vld [vmem:[%s4779_s0 + $0x168] sm:$0xff]  ;;  %v5083_v61 = vld [vmem:[#allocation22_spill] sm:$0xff] }
 0x26d   :  { %2091 = vst.msk [vmem:[%s4782_s3 + $0xe0] sm:$0xff] %vm78_vm0, %v2027_v39  ;;  %v1965_v26 = vadd.f32 %v1768_v14, %v1581_v25  ;;  %v1596_v19 = vmul.f32 %v2303_v37, %v5083_v61  ;;  %v2304_v25 = vld [vmem:[%s4779_s0 + $0x130] sm:$0xff] }
 0x26e   :  { %v2036_v48 = vmax.f32 %v1972_v60, 0.0  ;;  %v5084_v39 = vld [vmem:[#allocation28_spill] sm:$0xff] }
 0x26f   :  { %v2029_v62 = vmax.f32 %v1965_v26, 0.0  ;;  %v1813_v53 = vpop.permute.xlu0 %1812  ;;  %v1589_v31 = vmul.f32 %v2304_v25, %v5084_v39  ;;  %v2313_v25 = vld [vmem:[%s4779_s0 + $0x1b8] sm:$0xff] }
 0x270   :  { %2100 = vst.msk [vmem:[%s4782_s3 + $0x128] sm:$0xff] %vm78_vm0, %v2036_v48  ;;  %v1778_v10 = vpop.permute.xlu1 %1777  ;;  %v1974_v52 = vadd.f32 %v1813_v53, %v1590_v15  ;;  %v2305_v15 = vld [vmem:[%s4779_s0 + $0x178] sm:$0xff] }
 0x271   :  { %2093 = vst.msk [vmem:[%s4782_s3 + $0xf0] sm:$0xff] %vm78_vm0, %v2029_v62  ;;  %v1967_v20 = vadd.f32 %v1778_v10, %v1583_v0  ;;  %v1598_v48 = vmul.f32 %v2305_v15, %v4132_v1  ;;  %v5085_v0 = vld [vmem:[#allocation25_spill] sm:$0xff]  ;;  %v2315_v15 = vld [vmem:[%s4779_s0 + $0x1c8] sm:$0xff] }
 0x272   :  { %v2038_v54 = vmax.f32 %v1974_v52, 0.0  ;;  %v1591_v62 = vmul.f32 %v2306_v23, %v5085_v0 }
 0x273   :  { %v2031_v5 = vmax.f32 %v1967_v20, 0.0  ;;  %v1823_v11 = vpop.permute.xlu0 %1822 }
 0x274   :  { %2102 = vst.msk [vmem:[%s4782_s3 + $0x138] sm:$0xff] %vm78_vm0, %v2038_v54  ;;  %v1788_v17 = vpop.permute.xlu1 %1787  ;;  %v1976_v36 = vadd.f32 %v1823_v11, %v1592_v34  ;;  %v2308_v54 = vld [vmem:[%s4779_s0 + $0x150] sm:$0xff] }
 0x275   :  { %2095 = vst.msk [vmem:[%s4782_s3 + $0x100] sm:$0xff] %vm78_vm0, %v2031_v5  ;;  %v1969_v30 = vadd.f32 %v1788_v17, %v1585_v38  ;;  %v1593_v58 = vmul.f32 %v2308_v54, %v5086_v46 }
 0x276   :  { %v2040_v21 = vmax.f32 %v1976_v36, 0.0  ;;  %v2309_v36 = vld [vmem:[%s4779_s0 + $0x198] sm:$0xff] }
 0x277   :  { %v2033_v51 = vmax.f32 %v1969_v30, 0.0  ;;  %v1833_v29 = vpop.permute.xlu0 %1832  ;;  %v1602_v30 = vmul.f32 %v2309_v36, %v4160_v42 }
 0x278   :  { %2104 = vst.msk [vmem:[%s4782_s3 + $0x148] sm:$0xff] %vm78_vm0, %v2040_v21  ;;  %v1798_v55 = vpop.permute.xlu1 %1797  ;;  %v1978_v41 = vadd.f32 %v1833_v29, %v1594_v45  ;;  %v2310_v45 = vld [vmem:[%s4779_s0 + $0x160] sm:$0xff]  ;;  %v2311_v29 = vld [vmem:[%s4779_s0 + $0x1a8] sm:$0xff] }
 0x279   :  { %2097 = vst.msk [vmem:[%s4782_s3 + $0x110] sm:$0xff] %vm78_vm0, %v2033_v51  ;;  %v1971_v57 = vadd.f32 %v1798_v55, %v1587_v33  ;;  %v1595_v21 = vmul.f32 %v2310_v45, %v4167_v16  ;;  %v1604_v16 = vmul.f32 %v2311_v29, %v4174_v28 }
 0x27a   :  { %v2042_v49 = vmax.f32 %v1978_v41, 0.0  ;;  %v2312_v41 = vld [vmem:[%s4779_s0 + $0x170] sm:$0xff] }
 0x27b   :  { %v2035_v14 = vmax.f32 %v1971_v57, 0.0  ;;  %v1843_v60 = vpop.permute.xlu0 %1842  ;;  %v1597_v57 = vmul.f32 %v2312_v41, %v4181_v18  ;;  %v1606_v18 = vmul.f32 %v2313_v25, %v4188_v22 }
 0x27c   :  { %2106 = vst.msk [vmem:[%s4782_s3 + $0x158] sm:$0xff] %vm78_vm0, %v2042_v49  ;;  %v1808_v26 = vpop.permute.xlu1 %1807  ;;  %v1980_v24 = vadd.f32 %v1843_v60, %v1596_v19 }
 0x27d   :  { %2099 = vst.msk [vmem:[%s4782_s3 + $0x120] sm:$0xff] %vm78_vm0, %v2035_v14  ;;  %v1973_v12 = vadd.f32 %v1808_v26, %v1589_v31  ;;  %v2314_v31 = vld [vmem:[%s4779_s0 + $0x180] sm:$0xff] }
 0x27e   :  { %v2044_v8 = vmax.f32 %v1980_v24, 0.0  ;;  %v1599_v14 = vmul.f32 %v2314_v31, %v4195_v4  ;;  %v1608_v4 = vmul.f32 %v2315_v15, %v4202_v56 }
 0x27f   :  { %v2037_v53 = vmax.f32 %v1973_v12, 0.0  ;;  %v1853_v10 = vpop.permute.xlu0 %1852 }
 0x280   :  { %2108 = vst.msk [vmem:[%s4782_s3 + $0x168] sm:$0xff] %vm78_vm0, %v2044_v8  ;;  %v1818_v52 = vpop.permute.xlu1 %1817  ;;  %v1982_v20 = vadd.f32 %v1853_v10, %v1598_v48  ;;  %v2316_v8 = vld [vmem:[%s4779_s0 + $0x190] sm:$0xff] }
 0x281   :  { %2101 = vst.msk [vmem:[%s4782_s3 + $0x130] sm:$0xff] %vm78_vm0, %v2037_v53  ;;  %v1975_v1 = vadd.f32 %v1818_v52, %v1591_v62  ;;  %v1601_v23 = vmul.f32 %v2316_v8, %v4209_v50  ;;  %v2317_v52 = vld [vmem:[%s4779_s0 + $0x1d8] sm:$0xff] }
 0x282   :  { %v2046_v34 = vmax.f32 %v1982_v20, 0.0  ;;  %v1610_v50 = vmul.f32 %v2317_v52, %v4216_v9 }
 0x283   :  { %v2039_v38 = vmax.f32 %v1975_v1, 0.0  ;;  %v1863_v5 = vpop.permute.xlu0 %1862  ;;  %v2318_v1 = vld [vmem:[%s4779_s0 + $0x1a0] sm:$0xff] }
 0x284   :  { %2110 = vst.msk [vmem:[%s4782_s3 + $0x178] sm:$0xff] %vm78_vm0, %v2046_v34  ;;  %v1828_v11 = vpop.permute.xlu1 %1827  ;;  %v1984_v17 = vadd.f32 %v1863_v5, %v1600_v47  ;;  %v1603_v27 = vmul.f32 %v2318_v1, %v4223_v35  ;;  %v2320_v5 = vld [vmem:[%s4779_s0 + $0x1b0] sm:$0xff] }
 0x285   :  { %2103 = vst.msk [vmem:[%s4782_s3 + $0x140] sm:$0xff] %vm78_vm0, %v2039_v38  ;;  %v1977_v63 = vadd.f32 %v1828_v11, %v1593_v58  ;;  %v2319_v58 = vld [vmem:[%s4779_s0 + $0x1e8] sm:$0xff]  ;;  %v1605_v11 = vmul.f32 %v2320_v5, %v4237_v44 }
 0x286   :  { %v2048_v7 = vmax.f32 %v1984_v17, 0.0  ;;  %v1612_v35 = vmul.f32 %v2319_v58, %v4230_v32 }
 0x287   :  { %v2041_v2 = vmax.f32 %v1977_v63, 0.0  ;;  %v1873_v6 = vpop.permute.xlu0 %1872 }
 0x288   :  { %2112 = vst.msk [vmem:[%s4782_s3 + $0x188] sm:$0xff] %vm78_vm0, %v2048_v7  ;;  %v1838_v33 = vpop.permute.xlu1 %1837  ;;  %v1986_v51 = vadd.f32 %v1873_v6, %v1602_v30  ;;  %v2321_v7 = vld [vmem:[%s4779_s0 + $0x1f8] sm:$0xff] }
 0x289   :  { %2105 = vst.msk [vmem:[%s4782_s3 + $0x150] sm:$0xff] %vm78_vm0, %v2041_v2  ;;  %v1979_v42 = vadd.f32 %v1838_v33, %v1595_v21  ;;  %v1614_v44 = vmul.f32 %v2321_v7, %v4242_v43  ;;  %v2322_v21 = vld [vmem:[%s4779_s0 + $0x1c0] sm:$0xff] }
 0x28a   :  { %v2050_v55 = vmax.f32 %v1986_v51, 0.0  ;;  %v1607_v2 = vmul.f32 %v2322_v21, %v4246_v3  ;;  %v2323_v3 = vld [vmem:[%s4779_s0 + $0x1d0] sm:$0xff] }
 0x28b   :  { %v2043_v37 = vmax.f32 %v1979_v42, 0.0  ;;  %v1883_v61 = vpop.permute.xlu0 %1882 }
 0x28c   :  { %2114 = vst.msk [vmem:[%s4782_s3 + $0x198] sm:$0xff] %vm78_vm0, %v2050_v55  ;;  %v1848_v19 = vpop.permute.xlu1 %1847  ;;  %v1988_v49 = vadd.f32 %v1883_v61, %v1604_v16  ;;  %v1609_v16 = vmul.f32 %v2323_v3, %v4257_v13 }
 0x28d   :  { %2107 = vst.msk [vmem:[%s4782_s3 + $0x160] sm:$0xff] %vm78_vm0, %v2043_v37  ;;  %v1981_v28 = vadd.f32 %v1848_v19, %v1597_v57  ;;  %v2324_v37 = vld [vmem:[%s4779_s0 + $0x1e0] sm:$0xff] }
 0x28e   :  { %v2052_v39 = vmax.f32 %v1988_v49, 0.0  ;;  %v1611_v61 = vmul.f32 %v2324_v37, %v4272_v40 }
 0x28f   :  { %v2045_v60 = vmax.f32 %v1981_v28, 0.0  ;;  %v1893_v26 = vpop.permute.xlu0 %1892  ;;  %v2325_v28 = vld [vmem:[%s4779_s0 + $0x1f0] sm:$0xff] }
 0x290   :  { %2116 = vst.msk [vmem:[%s4782_s3 + $0x1a8] sm:$0xff] %vm78_vm0, %v2052_v39  ;;  %v1858_v24 = vpop.permute.xlu1 %1857  ;;  %v1990_v12 = vadd.f32 %v1893_v26, %v1606_v18  ;;  %v1613_v25 = vmul.f32 %v2325_v28, %v4285_v59 }
 0x291   :  { %2109 = vst.msk [vmem:[%s4782_s3 + $0x170] sm:$0xff] %vm78_vm0, %v2045_v60  ;;  %v1983_v22 = vadd.f32 %v1858_v24, %v1599_v14 }
 0x292   :  { %v2054_v48 = vmax.f32 %v1990_v12, 0.0 }
 0x293   :  { %v2047_v0 = vmax.f32 %v1983_v22, 0.0  ;;  %v1903_v62 = vpop.permute.xlu0 %1902 }
 0x294   :  { %2118 = vst.msk [vmem:[%s4782_s3 + $0x1b8] sm:$0xff] %vm78_vm0, %v2054_v48  ;;  %v1868_v53 = vpop.permute.xlu1 %1867  ;;  %v1992_v10 = vadd.f32 %v1903_v62, %v1608_v4 }
 0x295   :  { %2111 = vst.msk [vmem:[%s4782_s3 + $0x180] sm:$0xff] %vm78_vm0, %v2047_v0  ;;  %v1985_v56 = vadd.f32 %v1868_v53, %v1601_v23 }
 0x296   :  { %v2056_v20 = vmax.f32 %v1992_v10, 0.0 }
 0x297   :  { %v2049_v47 = vmax.f32 %v1985_v56, 0.0  ;;  %v1913_v34 = vpop.permute.xlu0 %1912 }
 0x298   :  { %2120 = vst.msk [vmem:[%s4782_s3 + $0x1c8] sm:$0xff] %vm78_vm0, %v2056_v20  ;;  %v1878_v54 = vpop.permute.xlu1 %1877  ;;  %v1994_v46 = vadd.f32 %v1913_v34, %v1610_v50 }
 0x299   :  { %2113 = vst.msk [vmem:[%s4782_s3 + $0x190] sm:$0xff] %vm78_vm0, %v2049_v47  ;;  %v1987_v9 = vadd.f32 %v1878_v54, %v1603_v27 }
 0x29a   :  { %v2058_v38 = vmax.f32 %v1994_v46, 0.0 }
 0x29b   :  { %v2051_v17 = vmax.f32 %v1987_v9, 0.0  ;;  %v1923_v63 = vpop.permute.xlu0 %1922 }
 0x29c   :  { %2122 = vst.msk [vmem:[%s4782_s3 + $0x1d8] sm:$0xff] %vm78_vm0, %v2058_v38  ;;  %v1888_v36 = vpop.permute.xlu1 %1887  ;;  %v1996_v30 = vadd.f32 %v1923_v63, %v1612_v35 }
 0x29d   :  { %2115 = vst.msk [vmem:[%s4782_s3 + $0x1a0] sm:$0xff] %vm78_vm0, %v2051_v17  ;;  %v1989_v32 = vadd.f32 %v1888_v36, %v1605_v11 }
 0x29e   :  { %v2060_v45 = vmax.f32 %v1996_v30, 0.0 }
 0x29f   :  { %v2053_v6 = vmax.f32 %v1989_v32, 0.0  ;;  %v1933_v33 = vpop.permute.xlu0 %1932 }
 0x2a0   :  { %2124 = vst.msk [vmem:[%s4782_s3 + $0x1e8] sm:$0xff] %vm78_vm0, %v2060_v45  ;;  %v1898_v51 = vpop.permute.xlu1 %1897  ;;  %v1998_v42 = vadd.f32 %v1933_v33, %v1614_v44 }
 0x2a1   :  { %2117 = vst.msk [vmem:[%s4782_s3 + $0x1b0] sm:$0xff] %vm78_vm0, %v2053_v6  ;;  %v1991_v43 = vadd.f32 %v1898_v51, %v1607_v2 }
 0x2a2   :  { %v2062_v29 = vmax.f32 %v1998_v42, 0.0 }
 0x2a3   :  { %v2055_v55 = vmax.f32 %v1991_v43, 0.0 }
 0x2a4   :  { %2126 = vst.msk [vmem:[%s4782_s3 + $0x1f8] sm:$0xff] %vm78_vm0, %v2062_v29  ;;  %v1908_v41 = vpop.permute.xlu1 %1907 }
 0x2a5   :  { %2119 = vst.msk [vmem:[%s4782_s3 + $0x1c0] sm:$0xff] %vm78_vm0, %v2055_v55  ;;  %v1993_v57 = vadd.f32 %v1908_v41, %v1609_v16 }
 0x2a7   :  { %v2057_v13 = vmax.f32 %v1993_v57, 0.0 }
 0x2a8   :  { %v1918_v19 = vpop.permute.xlu1 %1917 }
 0x2a9   :  { %2121 = vst.msk [vmem:[%s4782_s3 + $0x1d0] sm:$0xff] %vm78_vm0, %v2057_v13  ;;  %v1995_v49 = vadd.f32 %v1918_v19, %v1611_v61 }
 0x2ab   :  { %v2059_v18 = vmax.f32 %v1995_v49, 0.0 }
 0x2ac   :  { %v1928_v39 = vpop.permute.xlu1 %1927 }
 0x2ad   :  { %2123 = vst.msk [vmem:[%s4782_s3 + $0x1e0] sm:$0xff] %vm78_vm0, %v2059_v18  ;;  %v1997_v40 = vadd.f32 %v1928_v39, %v1613_v25 }
 0x2af   :  { %v2061_v31 = vmax.f32 %v1997_v40, 0.0 }
 0x2b1   :  { %2125 = vst.msk [vmem:[%s4782_s3 + $0x1f0] sm:$0xff] %vm78_vm0, %v2061_v31 }

</bundles_post_ra>
